<compile_context>
chip_gen: v6e
topology: v6e:2x2x1
jax: 0.10.0
libtpu: 0.0.40
codegen_flags: <defaults>
</compile_context>

<pallas_src>
import numpy as np
import jax
import jax.numpy as jnp
from jax.experimental import pallas as pl
from jax.experimental.pallas import tpu as pltpu

N_STEPS = 5
N_ETYPES = 4
LANE = 128


def _make_kernel(H, Lpad, n_steps, n_etypes, apply_softmax, woff, boff):
    H2, H3 = 2 * H, 3 * H

    def kernel(feat_ref, adj_ref, gic_ref, wslab_ref, w2_ref, bslab_ref,
               mean_ref, own_ref, u1b_ref, place0_ref, place1_ref, padb_ref,
               out_ref):
        f32, bf16 = jnp.float32, jnp.bfloat16
        feat = feat_ref[...]                                              # (N, H) f32
        N = feat.shape[0]

        # Loop-invariant loads, hoisted out of the unrolled 5-step loop.
        wmsg = wslab_ref[:, woff["wmsg"]:woff["wmsg"] + n_etypes * H3]    # (H, 4*3H) bf16
        whh = wslab_ref[:, woff["whh"]:woff["whh"] + H3]                  # (H, 3H) bf16
        gi_const = gic_ref[...]                                           # (N, 3H) f32
        bhh_n = jnp.broadcast_to(
            bslab_ref[:, boff["bhh_n"]:boff["bhh_n"] + H], (N, H))        # (N, H) f32

        # ---- GatedGraphConv: GRU input projection pre-folded into the message
        # weights -> per step: 1 msg matmul + 4 adjacency matmuls + 1 gh matmul.
        for _ in range(n_steps):
            fb = feat.astype(bf16)
            msg = jnp.dot(fb, wmsg,
                          preferred_element_type=f32).astype(bf16)       # (N, 4*3H)
            gi = gi_const
            for e in range(n_etypes):
                gi = gi + jnp.dot(adj_ref[e], msg[:, e * H3:(e + 1) * H3],
                                  preferred_element_type=f32)            # (N, 3H)
            gh = jnp.dot(fb, whh, preferred_element_type=f32)            # (N, 3H)
            rz = jax.nn.sigmoid(gi[:, :H2] + gh[:, :H2])                 # one EUP push for r|z
            r, z = rz[:, :H], rz[:, H:H2]
            n = jnp.tanh(gi[:, H2:] + r * (gh[:, H2:] + bhh_n))
            feat = (1.0 - z) * n + z * feat

        h = jnp.maximum(feat, 0.0)                                        # F.relu
        hb = h.astype(bf16)

        # ---- dgl.mean_nodes as a dense matmul ----
        hg = jnp.dot(mean_ref[...], hb, preferred_element_type=f32)       # (B, H)

        # ---- AddNode = Linear_3(H, H, num_nodes); last layer padded lane-dense ----
        a1w = wslab_ref[:, woff["a1w"]:woff["a1w"] + H]
        a2w = wslab_ref[:, woff["a2w"]:woff["a2w"] + H]
        a3w = wslab_ref[:, woff["a3w"]:woff["a3w"] + Lpad]
        a1b = bslab_ref[:, boff["a1b"]:boff["a1b"] + H]
        a2b = bslab_ref[:, boff["a2b"]:boff["a2b"] + H]
        a3b = bslab_ref[:, boff["a3b"]:boff["a3b"] + Lpad]
        t = jnp.tanh(jnp.dot(hg.astype(bf16), a1w,
                             preferred_element_type=f32) + a1b)
        t = jnp.tanh(jnp.dot(t.astype(bf16), a2w,
                             preferred_element_type=f32) + a2b)
        addnode_wide = jnp.dot(t.astype(bf16), a3w,
                               preferred_element_type=f32) + a3b          # (B, Lpad)

        # ---- Batch_Edge: stack_b @ e1ws + e1b precomputed outside (u1b_ref) ----
        e1wh = wslab_ref[:, woff["e1wh"]:woff["e1wh"] + H2]
        e2w = w2_ref[:, :H2]
        e3w = w2_ref[:, H2:H2 + 2]
        e2b = bslab_ref[:, boff["e2b"]:boff["e2b"] + H2]
        u = jnp.tanh(jnp.dot(hb, e1wh, preferred_element_type=f32) + u1b_ref[...])
        u = jnp.tanh(jnp.dot(u.astype(bf16), e2w,
                             preferred_element_type=f32) + e2b)
        edges01 = jnp.dot(u.astype(bf16), e3w, preferred_element_type=f32)  # (N, 2)

        # Parity-split placement (bf16, e3b folded into padb): broadcast each
        # parity column over its own 0/1 placement matrix, then a single
        # (B,N)x(N,Lpad) ownership matmul lands every edge prediction in its
        # flattened output column.
        # TODO(synk): at very large N, switch to the transposed form
        # (own * edges[:,c].T) @ place_c to drop the (N,Lpad) bf16 intermediate.
        placed = (edges01[:, 0:1].astype(bf16) * place0_ref[...]
                  + edges01[:, 1:2].astype(bf16) * place1_ref[...])         # (N, Lpad) bf16
        edges_wide = jnp.dot(own_ref[...], placed,
                             preferred_element_type=f32)                    # (B, Lpad)

        # padb: 0 on AddNode logits, e3b on valid edge slots, -10000 on
        # pad_sequence slots, -1e30 on lane-padding columns (kept in f32).
        logits = addnode_wide + edges_wide + padb_ref[...]                  # (B, Lpad)

        if apply_softmax:
            m = jnp.max(logits, axis=1, keepdims=True)
            e = jnp.exp(logits - m)
            s = jnp.sum(e, axis=1, keepdims=True)
            out_ref[...] = e * pl.reciprocal(s, approx=True)
        else:
            out_ref[...] = logits

    return kernel


def _full_spec(shape):
    nd = len(shape)
    return pl.BlockSpec(shape, lambda i, _nd=nd: (0,) * _nd)


def prepare_fused(p, g, num_nodes, max_nodes):
    """Fold/pad/cast parameters + graph structure into kernel-ready arrays (once)."""
    bf16, f32 = jnp.bfloat16, jnp.float32
    H = p["a1w"].shape[0]
    B, N = g["mean"].shape
    H3 = 3 * H
    L = num_nodes + 2 * max_nodes
    Lpad = max(LANE, ((L + LANE - 1) // LANE) * LANE)

    # adjacency multiplicities must be exactly representable in bf16.
    assert float(np.asarray(g["adj"]).max()) < 256.0

    # ---- GRU folds: gates (r,z,n) stacked along lanes; GRU input projection
    # folded into the per-etype message weights; input-side constants in f32.
    wih_cat = jnp.concatenate([p["wih"][0], p["wih"][1], p["wih"][2]], axis=1)   # (H, 3H)
    whh_cat = jnp.concatenate([p["whh"][0], p["whh"][1], p["whh"][2]], axis=1)   # (H, 3H)
    bias_i = jnp.concatenate([p["bih"][0] + p["bhh"][0],
                              p["bih"][1] + p["bhh"][1],
                              p["bih"][2]], axis=1)                              # (1, 3H)
    bhh_n = p["bhh"][2]                                                          # (1, H)
    wmsg = jnp.concatenate([jnp.matmul(p["wlin"][e], wih_cat)
                            for e in range(N_ETYPES)], axis=1)                   # (H, 4*3H)
    degbias = jnp.matmul(jnp.asarray(g["deg"], f32), p["blin"])                  # (N, H)
    gi_const = jnp.matmul(degbias, wih_cat) + bias_i                             # (N, 3H)

    # ---- AddNode last layer padded lane-dense ----
    a3w_pad = jnp.zeros((H, Lpad), f32).at[:, :num_nodes].set(p["a3w"])
    a3b_pad = jnp.zeros((1, Lpad), f32).at[:, :num_nodes].set(p["a3b"])

    # ---- weight / bias slabs (one DMA each instead of ~20) ----
    wparts = [("wmsg", wmsg), ("whh", whh_cat), ("a1w", p["a1w"]),
              ("a2w", p["a2w"]), ("a3w", a3w_pad), ("e1wh", p["e1wh"])]
    woff, o, arrs = {}, 0, []
    for name, arr in wparts:
        woff[name] = o
        o += arr.shape[1]
        arrs.append(arr)
    wslab = jnp.concatenate(arrs, axis=1).astype(bf16)                           # (H, 736)

    w2 = jnp.concatenate([p["e2w"], p["e3w"]], axis=1).astype(bf16)              # (2H, 2H+2)

    bparts = [("bhh_n", bhh_n), ("a1b", p["a1b"]), ("a2b", p["a2b"]),
              ("a3b", a3b_pad), ("e2b", p["e2b"])]
    boff, o, arrs = {}, 0, []
    for name, arr in bparts:
        boff[name] = o
        o += arr.shape[1]
        arrs.append(arr)
    bslab = jnp.concatenate(arrs, axis=1).astype(f32)                            # (1, 288)

    # ---- graph-structure matrices: ownership / parity placement / pad bias.
    # e3b is folded into the additive pad bias on valid edge slots.
    node_idx = np.asarray(g["node_idx"])
    valid = np.asarray(g["valid"])
    e3b = np.asarray(p["e3b"]).reshape(-1)
    own = np.zeros((B, N), np.float32)        # own[b, n] = node n belongs to graph b
    place0 = np.zeros((N, Lpad), np.float32)  # parity-0 column of node n's slot
    place1 = np.zeros((N, Lpad), np.float32)  # parity-1 column of node n's slot
    padb = np.full((B, Lpad), -1e30, np.float32)   # lane padding (logits stay f32)
    padb[:, :num_nodes] = 0.0
    for b in range(B):
        for j in range(max_nodes):
            c0, c1 = num_nodes + 2 * j, num_nodes + 2 * j + 1
            if valid[b, j]:
                n = int(node_idx[b, j])
                own[b, n] = 1.0
                place0[n, c0] = 1.0
                place1[n, c1] = 1.0
                padb[b, c0] = e3b[0]          # Edges final bias, folded here
                padb[b, c1] = e3b[1]
            else:
                padb[b, c0] = -10000.0        # pad_sequence(padding_value=-10000)
                padb[b, c1] = -10000.0

    c = lambda x: jnp.asarray(x, bf16)
    return dict(
        feat0=jnp.asarray(g["feat0"], jnp.float32),
        adj=c(g["adj"]), gi_const=jnp.asarray(gi_const, jnp.float32),
        wslab=wslab, w2=w2, bslab=bslab,
        mean=c(g["mean"]), own=c(own),
        place0=c(place0), place1=c(place1), padb=jnp.asarray(padb, jnp.float32),
        # pieces of the tiny runtime chain evaluated in the wrapper:
        sel=jnp.asarray(g["sel"], jnp.float32),
        last_node=jnp.asarray(g["last_node"], jnp.float32),
        new=jnp.asarray(p["new"], jnp.float32), neb=jnp.asarray(p["neb"], jnp.float32),
        e1ws=jnp.asarray(p["e1ws"], jnp.float32), e1b=jnp.asarray(p["e1b"], jnp.float32),
        meta=dict(H=int(H), B=int(B), N=int(N), L=int(L), Lpad=int(Lpad),
                  woff=woff, boff=boff),
    )


def baseline_forward(fused, softmax=True):
    """BaseLine.forward with mask=False (default). Returns (B, num_nodes + 2*max_nodes)."""
    # TODO(synk): mask=True branch (last_action_node * node_mask * -1e5) is not
    # exercised by the default forward and is left out.
    # TODO(synk): at realistic graph sizes (N in the thousands) the dense
    # (4,N,N) adjacency needs a node-row-tiled "parallel" grid axis with
    # feature-major layout and Buffered(2-3) streaming instead of grid=(1,)
    # full-array specs (and single-buffered constants on v5e).
    meta = fused["meta"]
    H, B, L, Lpad = meta["H"], meta["B"], meta["L"], meta["Lpad"]

    # Tiny runtime chain (NodeEmbed of last_node -> per-node Edges-layer-1 bias)
    # kept as plain XLA ops; everything else it touches is constant.
    ne = jnp.matmul(fused["last_node"], fused["new"]) + fused["neb"]             # (B, H)
    u1_bias = jnp.matmul(fused["sel"], jnp.matmul(ne, fused["e1ws"])) + fused["e1b"]  # (N, 2H)

    kernel = _make_kernel(H, Lpad, N_STEPS, N_ETYPES, softmax,
                          meta["woff"], meta["boff"])
    inputs = [fused["feat0"], fused["adj"], fused["gi_const"], fused["wslab"],
              fused["w2"], fused["bslab"], fused["mean"], fused["own"],
              u1_bias.astype(jnp.float32), fused["place0"], fused["place1"],
              fused["padb"]]
    out = pl.pallas_call(
        kernel,
        out_shape=jax.ShapeDtypeStruct((B, Lpad), jnp.float32),
        grid=(1,),
        in_specs=[_full_spec(x.shape) for x in inputs],
        out_specs=_full_spec((B, Lpad)),
        compiler_params=pltpu.CompilerParams(
            dimension_semantics=("arbitrary",),
            vmem_limit_bytes=32 * 1024 * 1024),
    )(*inputs)
    return out[:, :L]


def reference_forward(p, g, softmax=True):
    """Pure-JAX f32 mirror of BaseLine.forward, used only to validate the kernel."""
    feat = g["feat0"]
    degbias = g["deg"] @ p["blin"]
    for _ in range(N_STEPS):
        a = degbias
        for e in range(N_ETYPES):
            a = a + g["adj"][e] @ (feat @ p["wlin"][e])
        r = jax.nn.sigmoid(a @ p["wih"][0] + p["bih"][0] + feat @ p["whh"][0] + p["bhh"][0])
        z = jax.nn.sigmoid(a @ p["wih"][1] + p["bih"][1] + feat @ p["whh"][1] + p["bhh"][1])
        n = jnp.tanh(a @ p["wih"][2] + p["bih"][2] + r * (feat @ p["whh"][2] + p["bhh"][2]))
        feat = (1.0 - z) * n + z * feat
    h = jnp.maximum(feat, 0.0)
    hg = g["mean"] @ h
    t = jnp.tanh(hg @ p["a1w"] + p["a1b"])
    t = jnp.tanh(t @ p["a2w"] + p["a2b"])
    addnode = t @ p["a3w"] + p["a3b"]
    ne = g["last_node"] @ p["new"] + p["neb"]
    stack_b = g["sel"] @ ne
    u = jnp.tanh(h @ p["e1wh"] + stack_b @ p["e1ws"] + p["e1b"])
    u = jnp.tanh(u @ p["e2w"] + p["e2b"])
    edges = u @ p["e3w"] + p["e3b"]
    padded = jnp.where(g["valid"][..., None], edges[g["node_idx"]], -10000.0)
    out = jnp.concatenate([addnode, padded.reshape(addnode.shape[0], -1)], axis=1)
    return jax.nn.softmax(out, axis=1) if softmax else out


if __name__ == "__main__":
    in_dim, hidden_dim, num_nodes = 4, 32, 8
    B = 2
    nodes_per_graph = [5, 3]
    N = sum(nodes_per_graph)
    max_nodes = max(nodes_per_graph)
    # (src, dst, etype); graph 0 = nodes 0..4, graph 1 = nodes 5..7
    edge_list = [
        (0, 1, 0), (1, 0, 0), (1, 2, 1), (2, 1, 1), (2, 3, 2), (3, 2, 2),
        (3, 4, 3), (4, 3, 3), (0, 4, 1),
        (5, 6, 0), (6, 5, 0), (6, 7, 2), (7, 6, 2), (5, 7, 3),
    ]

    adj = np.zeros((N_ETYPES, N, N), np.float32)
    deg = np.zeros((N, N_ETYPES), np.float32)
    for s, d, e in edge_list:
        adj[e, d, s] += 1.0
        deg[d, e] += 1.0

    graph_id = np.repeat(np.arange(B), nodes_per_graph)
    mean_mat = np.zeros((B, N), np.float32)
    sel_mat = np.zeros((N, B), np.float32)
    for n, b in enumerate(graph_id):
        mean_mat[b, n] = 1.0 / nodes_per_graph[b]
        sel_mat[n, b] = 1.0

    node_idx = np.zeros((B, max_nodes), np.int32)
    valid = np.zeros((B, max_nodes), bool)
    off = 0
    for b, nb in enumerate(nodes_per_graph):
        node_idx[b, :nb] = np.arange(off, off + nb)
        valid[b, :nb] = True
        off += nb

    key = jax.random.PRNGKey(0)
    keys = iter(jax.random.split(key, 32))

    atomic = jax.random.normal(next(keys), (N, in_dim), jnp.float32)      # graph.ndata['atomic']
    last_node = jax.random.normal(next(keys), (B, in_dim), jnp.float32)
    # GatedGraphConv zero-pads node features from in_dim to hidden_dim
    feat0 = jnp.concatenate(
        [atomic, jnp.zeros((N, hidden_dim - in_dim), jnp.float32)], axis=1)

    def lin(k, fi, fo):
        kw, kb = jax.random.split(k)
        s = 1.0 / np.sqrt(fi)
        return (jax.random.uniform(kw, (fi, fo), jnp.float32, -s, s),       # stored as W.T
                jax.random.uniform(kb, (1, fo), jnp.float32, -s, s))

    H = hidden_dim
    wlin_l, blin_l = [], []
    for _ in range(N_ETYPES):
        w, b = lin(next(keys), H, H)
        wlin_l.append(w)
        blin_l.append(b[0])
    wlin = jnp.stack(wlin_l)                                                # (E, H, H)
    blin = jnp.stack(blin_l)                                                # (E, H)

    s = 1.0 / np.sqrt(H)
    wih = jax.random.uniform(next(keys), (3, H, H), jnp.float32, -s, s)     # gates r, z, n (W.T)
    whh = jax.random.uniform(next(keys), (3, H, H), jnp.float32, -s, s)
    bih = jax.random.uniform(next(keys), (3, 1, H), jnp.float32, -s, s)
    bhh = jax.random.uniform(next(keys), (3, 1, H), jnp.float32, -s, s)

    a1w, a1b = lin(next(keys), H, H)
    a2w, a2b = lin(next(keys), H, H)
    a3w, a3b = lin(next(keys), H, num_nodes)
    new_w, neb = lin(next(keys), in_dim, H)
    e1w, e1b = lin(next(keys), 2 * H, 2 * H)
    e2w, e2b = lin(next(keys), 2 * H, 2 * H)
    e3w, e3b = lin(next(keys), 2 * H, 2)

    params = dict(
        wlin=wlin, blin=blin, wih=wih, whh=whh, bih=bih, bhh=bhh,
        a1w=a1w, a1b=a1b, a2w=a2w, a2b=a2b, a3w=a3w, a3b=a3b,
        new=new_w, neb=neb,
        e1wh=e1w[:H], e1ws=e1w[H:], e1b=e1b,
        e2w=e2w, e2b=e2b, e3w=e3w, e3b=e3b)
    gdata = dict(
        feat0=feat0, adj=jnp.asarray(adj), deg=jnp.asarray(deg),
        mean=jnp.asarray(mean_mat), sel=jnp.asarray(sel_mat),
        last_node=last_node, node_idx=jnp.asarray(node_idx),
        valid=jnp.asarray(valid))

    fused = prepare_fused(params, gdata, num_nodes, max_nodes)

    out = baseline_forward(fused, softmax=True)
    out = jax.block_until_ready(out)
    ref = reference_forward(params, gdata, softmax=True)
    np.testing.assert_allclose(np.asarray(out), np.asarray(ref), atol=2e-2, rtol=2e-2)
    assert out.shape == (B, num_nodes + 2 * max_nodes)

    out_raw = jax.block_until_ready(baseline_forward(fused, softmax=False))
    ref_raw = reference_forward(params, gdata, softmax=False)
    np.testing.assert_allclose(np.asarray(out_raw), np.asarray(ref_raw), atol=5e-2, rtol=5e-2)

    print("KERNEL_OK")
</pallas_src>

<mosaic_0001>
module attributes {stable_mosaic.version = 11 : i64} {
  func.func @kernel(%arg0: i32, %arg1: memref<8x32xf32, #tpu.memory_space<vmem>>, %arg2: memref<4x8x8xbf16, #tpu.memory_space<vmem>>, %arg3: memref<8x96xf32, #tpu.memory_space<vmem>>, %arg4: memref<32x736xbf16, #tpu.memory_space<vmem>>, %arg5: memref<64x66xbf16, #tpu.memory_space<vmem>>, %arg6: memref<1x288xf32, #tpu.memory_space<vmem>>, %arg7: memref<2x8xbf16, #tpu.memory_space<vmem>>, %arg8: memref<2x8xbf16, #tpu.memory_space<vmem>>, %arg9: memref<8x64xf32, #tpu.memory_space<vmem>>, %arg10: memref<8x128xbf16, #tpu.memory_space<vmem>>, %arg11: memref<8x128xbf16, #tpu.memory_space<vmem>>, %arg12: memref<2x128xf32, #tpu.memory_space<vmem>>, %arg13: memref<2x128xf32, #tpu.memory_space<vmem>>) attributes {dimension_semantics = [#tpu.dimension_semantics<arbitrary>], iteration_bounds = array<i64: 1>, scalar_prefetch = 0 : i64, scratch_operands = 0 : i64, tpu.core_type = #tpu.core_type<tc>, window_params = [{pipeline_mode = #tpu.pipeline_mode<synchronous>, transform_indices = @transform_0, window_bounds = array<i64: 8, 32>}, {pipeline_mode = #tpu.pipeline_mode<synchronous>, transform_indices = @transform_1, window_bounds = array<i64: 4, 8, 8>}, {pipeline_mode = #tpu.pipeline_mode<synchronous>, transform_indices = @transform_2, window_bounds = array<i64: 8, 96>}, {pipeline_mode = #tpu.pipeline_mode<synchronous>, transform_indices = @transform_3, window_bounds = array<i64: 32, 736>}, {pipeline_mode = #tpu.pipeline_mode<synchronous>, transform_indices = @transform_4, window_bounds = array<i64: 64, 66>}, {pipeline_mode = #tpu.pipeline_mode<synchronous>, transform_indices = @transform_5, window_bounds = array<i64: 1, 288>}, {pipeline_mode = #tpu.pipeline_mode<synchronous>, transform_indices = @transform_6, window_bounds = array<i64: 2, 8>}, {pipeline_mode = #tpu.pipeline_mode<synchronous>, transform_indices = @transform_7, window_bounds = array<i64: 2, 8>}, {pipeline_mode = #tpu.pipeline_mode<synchronous>, transform_indices = @transform_8, window_bounds = array<i64: 8, 64>}, {pipeline_mode = #tpu.pipeline_mode<synchronous>, transform_indices = @transform_9, window_bounds = array<i64: 8, 128>}, {pipeline_mode = #tpu.pipeline_mode<synchronous>, transform_indices = @transform_10, window_bounds = array<i64: 8, 128>}, {pipeline_mode = #tpu.pipeline_mode<synchronous>, transform_indices = @transform_11, window_bounds = array<i64: 2, 128>}, {pipeline_mode = #tpu.pipeline_mode<synchronous>, transform_indices = @transform_12, window_bounds = array<i64: 2, 128>}]} {
    %c0 = arith.constant 0 : index
    %c0_0 = arith.constant 0 : index
    %0 = vector.load %arg1[%c0, %c0_0] : memref<8x32xf32, #tpu.memory_space<vmem>>, vector<8x32xf32>
    %c0_1 = arith.constant 0 : index
    %c0_2 = arith.constant 0 : index
    %1 = vector.load %arg4[%c0_1, %c0_2] : memref<32x736xbf16, #tpu.memory_space<vmem>>, vector<32x384xbf16>
    %c0_3 = arith.constant 0 : index
    %c384 = arith.constant 384 : index
    %2 = vector.load %arg4[%c0_3, %c384] : memref<32x736xbf16, #tpu.memory_space<vmem>>, vector<32x96xbf16>
    %c0_4 = arith.constant 0 : index
    %c0_5 = arith.constant 0 : index
    %3 = vector.load %arg3[%c0_4, %c0_5] : memref<8x96xf32, #tpu.memory_space<vmem>>, vector<8x96xf32>
    %c0_6 = arith.constant 0 : index
    %c0_7 = arith.constant 0 : index
    %4 = vector.load %arg6[%c0_6, %c0_7] : memref<1x288xf32, #tpu.memory_space<vmem>>, vector<1x32xf32>
    %5 = vector.shape_cast %4 : vector<1x32xf32> to vector<1x32xf32>
    %6 = vector.broadcast %5 : vector<1x32xf32> to vector<8x32xf32>
    %7 = arith.truncf %0 : vector<8x32xf32> to vector<8x32xbf16>
    %cst = arith.constant dense<0.000000e+00> : vector<8x384xf32>
    %8 = tpu.matmul %7, %1, %cst {dimension_numbers = #tpu.dot_dimension_numbers<[1], [0], [0], [1], [0, 0, 1, 1], [], []>} : vector<8x32xbf16>, vector<32x384xbf16>, vector<8x384xf32> -> vector<8x384xf32>
    %9 = arith.truncf %8 : vector<8x384xf32> to vector<8x384xbf16>
    %c0_8 = arith.constant 0 : index
    %c0_9 = arith.constant 0 : index
    %c0_10 = arith.constant 0 : index
    %10 = vector.load %arg2[%c0_8, %c0_9, %c0_10] : memref<4x8x8xbf16, #tpu.memory_space<vmem>>, vector<1x8x8xbf16>
    %11 = vector.shape_cast %10 : vector<1x8x8xbf16> to vector<8x8xbf16>
    %12 = vector.extract_strided_slice %9 {offsets = [0, 0], sizes = [8, 96], strides = [1, 1]} : vector<8x384xbf16> to vector<8x96xbf16>
    %cst_11 = arith.constant dense<0.000000e+00> : vector<8x96xf32>
    %13 = tpu.matmul %11, %12, %cst_11 {dimension_numbers = #tpu.dot_dimension_numbers<[1], [0], [0], [1], [0, 0, 1, 1], [], []>} : vector<8x8xbf16>, vector<8x96xbf16>, vector<8x96xf32> -> vector<8x96xf32>
    %14 = arith.addf %3, %13 : vector<8x96xf32>
    %c1 = arith.constant 1 : index
    %c0_12 = arith.constant 0 : index
    %c0_13 = arith.constant 0 : index
    %15 = vector.load %arg2[%c1, %c0_12, %c0_13] : memref<4x8x8xbf16, #tpu.memory_space<vmem>>, vector<1x8x8xbf16>
    %16 = vector.shape_cast %15 : vector<1x8x8xbf16> to vector<8x8xbf16>
    %17 = vector.extract_strided_slice %9 {offsets = [0, 96], sizes = [8, 96], strides = [1, 1]} : vector<8x384xbf16> to vector<8x96xbf16>
    %cst_14 = arith.constant dense<0.000000e+00> : vector<8x96xf32>
    %18 = tpu.matmul %16, %17, %cst_14 {dimension_numbers = #tpu.dot_dimension_numbers<[1], [0], [0], [1], [0, 0, 1, 1], [], []>} : vector<8x8xbf16>, vector<8x96xbf16>, vector<8x96xf32> -> vector<8x96xf32>
    %19 = arith.addf %14, %18 : vector<8x96xf32>
    %c2 = arith.constant 2 : index
    %c0_15 = arith.constant 0 : index
    %c0_16 = arith.constant 0 : index
    %20 = vector.load %arg2[%c2, %c0_15, %c0_16] : memref<4x8x8xbf16, #tpu.memory_space<vmem>>, vector<1x8x8xbf16>
    %21 = vector.shape_cast %20 : vector<1x8x8xbf16> to vector<8x8xbf16>
    %22 = vector.extract_strided_slice %9 {offsets = [0, 192], sizes = [8, 96], strides = [1, 1]} : vector<8x384xbf16> to vector<8x96xbf16>
    %cst_17 = arith.constant dense<0.000000e+00> : vector<8x96xf32>
    %23 = tpu.matmul %21, %22, %cst_17 {dimension_numbers = #tpu.dot_dimension_numbers<[1], [0], [0], [1], [0, 0, 1, 1], [], []>} : vector<8x8xbf16>, vector<8x96xbf16>, vector<8x96xf32> -> vector<8x96xf32>
    %24 = arith.addf %19, %23 : vector<8x96xf32>
    %c3 = arith.constant 3 : index
    %c0_18 = arith.constant 0 : index
    %c0_19 = arith.constant 0 : index
    %25 = vector.load %arg2[%c3, %c0_18, %c0_19] : memref<4x8x8xbf16, #tpu.memory_space<vmem>>, vector<1x8x8xbf16>
    %26 = vector.shape_cast %25 : vector<1x8x8xbf16> to vector<8x8xbf16>
    %27 = vector.extract_strided_slice %9 {offsets = [0, 288], sizes = [8, 96], strides = [1, 1]} : vector<8x384xbf16> to vector<8x96xbf16>
    %cst_20 = arith.constant dense<0.000000e+00> : vector<8x96xf32>
    %28 = tpu.matmul %26, %27, %cst_20 {dimension_numbers = #tpu.dot_dimension_numbers<[1], [0], [0], [1], [0, 0, 1, 1], [], []>} : vector<8x8xbf16>, vector<8x96xbf16>, vector<8x96xf32> -> vector<8x96xf32>
    %29 = arith.addf %24, %28 : vector<8x96xf32>
    %cst_21 = arith.constant dense<0.000000e+00> : vector<8x96xf32>
    %30 = tpu.matmul %7, %2, %cst_21 {dimension_numbers = #tpu.dot_dimension_numbers<[1], [0], [0], [1], [0, 0, 1, 1], [], []>} : vector<8x32xbf16>, vector<32x96xbf16>, vector<8x96xf32> -> vector<8x96xf32>
    %31 = vector.extract_strided_slice %29 {offsets = [0, 0], sizes = [8, 64], strides = [1, 1]} : vector<8x96xf32> to vector<8x64xf32>
    %32 = vector.extract_strided_slice %30 {offsets = [0, 0], sizes = [8, 64], strides = [1, 1]} : vector<8x96xf32> to vector<8x64xf32>
    %33 = arith.addf %31, %32 : vector<8x64xf32>
    %34 = arith.negf %33 : vector<8x64xf32>
    %35 = math.exp %34 : vector<8x64xf32>
    %cst_22 = arith.constant 1.000000e+00 : f32
    %36 = vector.broadcast %cst_22 : f32 to vector<8x64xf32>
    %37 = arith.addf %36, %35 : vector<8x64xf32>
    %38 = arith.divf %36, %37 : vector<8x64xf32>
    %39 = vector.extract_strided_slice %38 {offsets = [0, 0], sizes = [8, 32], strides = [1, 1]} : vector<8x64xf32> to vector<8x32xf32>
    %40 = vector.extract_strided_slice %38 {offsets = [0, 32], sizes = [8, 32], strides = [1, 1]} : vector<8x64xf32> to vector<8x32xf32>
    %41 = vector.extract_strided_slice %29 {offsets = [0, 64], sizes = [8, 32], strides = [1, 1]} : vector<8x96xf32> to vector<8x32xf32>
    %42 = vector.extract_strided_slice %30 {offsets = [0, 64], sizes = [8, 32], strides = [1, 1]} : vector<8x96xf32> to vector<8x32xf32>
    %43 = arith.addf %42, %6 : vector<8x32xf32>
    %44 = arith.mulf %39, %43 : vector<8x32xf32>
    %45 = arith.addf %41, %44 : vector<8x32xf32>
    %46 = math.tanh %45 : vector<8x32xf32>
    %cst_23 = arith.constant 1.000000e+00 : f32
    %47 = vector.broadcast %cst_23 : f32 to vector<8x32xf32>
    %48 = arith.subf %47, %40 : vector<8x32xf32>
    %49 = arith.mulf %48, %46 : vector<8x32xf32>
    %50 = arith.mulf %40, %0 : vector<8x32xf32>
    %51 = arith.addf %49, %50 : vector<8x32xf32>
    %52 = arith.truncf %51 : vector<8x32xf32> to vector<8x32xbf16>
    %cst_24 = arith.constant dense<0.000000e+00> : vector<8x384xf32>
    %53 = tpu.matmul %52, %1, %cst_24 {dimension_numbers = #tpu.dot_dimension_numbers<[1], [0], [0], [1], [0, 0, 1, 1], [], []>} : vector<8x32xbf16>, vector<32x384xbf16>, vector<8x384xf32> -> vector<8x384xf32>
    %54 = arith.truncf %53 : vector<8x384xf32> to vector<8x384xbf16>
    %c0_25 = arith.constant 0 : index
    %c0_26 = arith.constant 0 : index
    %c0_27 = arith.constant 0 : index
    %55 = vector.load %arg2[%c0_25, %c0_26, %c0_27] : memref<4x8x8xbf16, #tpu.memory_space<vmem>>, vector<1x8x8xbf16>
    %56 = vector.shape_cast %55 : vector<1x8x8xbf16> to vector<8x8xbf16>
    %57 = vector.extract_strided_slice %54 {offsets = [0, 0], sizes = [8, 96], strides = [1, 1]} : vector<8x384xbf16> to vector<8x96xbf16>
    %cst_28 = arith.constant dense<0.000000e+00> : vector<8x96xf32>
    %58 = tpu.matmul %56, %57, %cst_28 {dimension_numbers = #tpu.dot_dimension_numbers<[1], [0], [0], [1], [0, 0, 1, 1], [], []>} : vector<8x8xbf16>, vector<8x96xbf16>, vector<8x96xf32> -> vector<8x96xf32>
    %59 = arith.addf %3, %58 : vector<8x96xf32>
    %c1_29 = arith.constant 1 : index
    %c0_30 = arith.constant 0 : index
    %c0_31 = arith.constant 0 : index
    %60 = vector.load %arg2[%c1_29, %c0_30, %c0_31] : memref<4x8x8xbf16, #tpu.memory_space<vmem>>, vector<1x8x8xbf16>
    %61 = vector.shape_cast %60 : vector<1x8x8xbf16> to vector<8x8xbf16>
    %62 = vector.extract_strided_slice %54 {offsets = [0, 96], sizes = [8, 96], strides = [1, 1]} : vector<8x384xbf16> to vector<8x96xbf16>
    %cst_32 = arith.constant dense<0.000000e+00> : vector<8x96xf32>
    %63 = tpu.matmul %61, %62, %cst_32 {dimension_numbers = #tpu.dot_dimension_numbers<[1], [0], [0], [1], [0, 0, 1, 1], [], []>} : vector<8x8xbf16>, vector<8x96xbf16>, vector<8x96xf32> -> vector<8x96xf32>
    %64 = arith.addf %59, %63 : vector<8x96xf32>
    %c2_33 = arith.constant 2 : index
    %c0_34 = arith.constant 0 : index
    %c0_35 = arith.constant 0 : index
    %65 = vector.load %arg2[%c2_33, %c0_34, %c0_35] : memref<4x8x8xbf16, #tpu.memory_space<vmem>>, vector<1x8x8xbf16>
    %66 = vector.shape_cast %65 : vector<1x8x8xbf16> to vector<8x8xbf16>
    %67 = vector.extract_strided_slice %54 {offsets = [0, 192], sizes = [8, 96], strides = [1, 1]} : vector<8x384xbf16> to vector<8x96xbf16>
    %cst_36 = arith.constant dense<0.000000e+00> : vector<8x96xf32>
    %68 = tpu.matmul %66, %67, %cst_36 {dimension_numbers = #tpu.dot_dimension_numbers<[1], [0], [0], [1], [0, 0, 1, 1], [], []>} : vector<8x8xbf16>, vector<8x96xbf16>, vector<8x96xf32> -> vector<8x96xf32>
    %69 = arith.addf %64, %68 : vector<8x96xf32>
    %c3_37 = arith.constant 3 : index
    %c0_38 = arith.constant 0 : index
    %c0_39 = arith.constant 0 : index
    %70 = vector.load %arg2[%c3_37, %c0_38, %c0_39] : memref<4x8x8xbf16, #tpu.memory_space<vmem>>, vector<1x8x8xbf16>
    %71 = vector.shape_cast %70 : vector<1x8x8xbf16> to vector<8x8xbf16>
    %72 = vector.extract_strided_slice %54 {offsets = [0, 288], sizes = [8, 96], strides = [1, 1]} : vector<8x384xbf16> to vector<8x96xbf16>
    %cst_40 = arith.constant dense<0.000000e+00> : vector<8x96xf32>
    %73 = tpu.matmul %71, %72, %cst_40 {dimension_numbers = #tpu.dot_dimension_numbers<[1], [0], [0], [1], [0, 0, 1, 1], [], []>} : vector<8x8xbf16>, vector<8x96xbf16>, vector<8x96xf32> -> vector<8x96xf32>
    %74 = arith.addf %69, %73 : vector<8x96xf32>
    %cst_41 = arith.constant dense<0.000000e+00> : vector<8x96xf32>
    %75 = tpu.matmul %52, %2, %cst_41 {dimension_numbers = #tpu.dot_dimension_numbers<[1], [0], [0], [1], [0, 0, 1, 1], [], []>} : vector<8x32xbf16>, vector<32x96xbf16>, vector<8x96xf32> -> vector<8x96xf32>
    %76 = vector.extract_strided_slice %74 {offsets = [0, 0], sizes = [8, 64], strides = [1, 1]} : vector<8x96xf32> to vector<8x64xf32>
    %77 = vector.extract_strided_slice %75 {offsets = [0, 0], sizes = [8, 64], strides = [1, 1]} : vector<8x96xf32> to vector<8x64xf32>
    %78 = arith.addf %76, %77 : vector<8x64xf32>
    %79 = arith.negf %78 : vector<8x64xf32>
    %80 = math.exp %79 : vector<8x64xf32>
    %cst_42 = arith.constant 1.000000e+00 : f32
    %81 = vector.broadcast %cst_42 : f32 to vector<8x64xf32>
    %82 = arith.addf %81, %80 : vector<8x64xf32>
    %83 = arith.divf %81, %82 : vector<8x64xf32>
    %84 = vector.extract_strided_slice %83 {offsets = [0, 0], sizes = [8, 32], strides = [1, 1]} : vector<8x64xf32> to vector<8x32xf32>
    %85 = vector.extract_strided_slice %83 {offsets = [0, 32], sizes = [8, 32], strides = [1, 1]} : vector<8x64xf32> to vector<8x32xf32>
    %86 = vector.extract_strided_slice %74 {offsets = [0, 64], sizes = [8, 32], strides = [1, 1]} : vector<8x96xf32> to vector<8x32xf32>
    %87 = vector.extract_strided_slice %75 {offsets = [0, 64], sizes = [8, 32], strides = [1, 1]} : vector<8x96xf32> to vector<8x32xf32>
    %88 = arith.addf %87, %6 : vector<8x32xf32>
    %89 = arith.mulf %84, %88 : vector<8x32xf32>
    %90 = arith.addf %86, %89 : vector<8x32xf32>
    %91 = math.tanh %90 : vector<8x32xf32>
    %cst_43 = arith.constant 1.000000e+00 : f32
    %92 = vector.broadcast %cst_43 : f32 to vector<8x32xf32>
    %93 = arith.subf %92, %85 : vector<8x32xf32>
    %94 = arith.mulf %93, %91 : vector<8x32xf32>
    %95 = arith.mulf %85, %51 : vector<8x32xf32>
    %96 = arith.addf %94, %95 : vector<8x32xf32>
    %97 = arith.truncf %96 : vector<8x32xf32> to vector<8x32xbf16>
    %cst_44 = arith.constant dense<0.000000e+00> : vector<8x384xf32>
    %98 = tpu.matmul %97, %1, %cst_44 {dimension_numbers = #tpu.dot_dimension_numbers<[1], [0], [0], [1], [0, 0, 1, 1], [], []>} : vector<8x32xbf16>, vector<32x384xbf16>, vector<8x384xf32> -> vector<8x384xf32>
    %99 = arith.truncf %98 : vector<8x384xf32> to vector<8x384xbf16>
    %c0_45 = arith.constant 0 : index
    %c0_46 = arith.constant 0 : index
    %c0_47 = arith.constant 0 : index
    %100 = vector.load %arg2[%c0_45, %c0_46, %c0_47] : memref<4x8x8xbf16, #tpu.memory_space<vmem>>, vector<1x8x8xbf16>
    %101 = vector.shape_cast %100 : vector<1x8x8xbf16> to vector<8x8xbf16>
    %102 = vector.extract_strided_slice %99 {offsets = [0, 0], sizes = [8, 96], strides = [1, 1]} : vector<8x384xbf16> to vector<8x96xbf16>
    %cst_48 = arith.constant dense<0.000000e+00> : vector<8x96xf32>
    %103 = tpu.matmul %101, %102, %cst_48 {dimension_numbers = #tpu.dot_dimension_numbers<[1], [0], [0], [1], [0, 0, 1, 1], [], []>} : vector<8x8xbf16>, vector<8x96xbf16>, vector<8x96xf32> -> vector<8x96xf32>
    %104 = arith.addf %3, %103 : vector<8x96xf32>
    %c1_49 = arith.constant 1 : index
    %c0_50 = arith.constant 0 : index
    %c0_51 = arith.constant 0 : index
    %105 = vector.load %arg2[%c1_49, %c0_50, %c0_51] : memref<4x8x8xbf16, #tpu.memory_space<vmem>>, vector<1x8x8xbf16>
    %106 = vector.shape_cast %105 : vector<1x8x8xbf16> to vector<8x8xbf16>
    %107 = vector.extract_strided_slice %99 {offsets = [0, 96], sizes = [8, 96], strides = [1, 1]} : vector<8x384xbf16> to vector<8x96xbf16>
    %cst_52 = arith.constant dense<0.000000e+00> : vector<8x96xf32>
    %108 = tpu.matmul %106, %107, %cst_52 {dimension_numbers = #tpu.dot_dimension_numbers<[1], [0], [0], [1], [0, 0, 1, 1], [], []>} : vector<8x8xbf16>, vector<8x96xbf16>, vector<8x96xf32> -> vector<8x96xf32>
    %109 = arith.addf %104, %108 : vector<8x96xf32>
    %c2_53 = arith.constant 2 : index
    %c0_54 = arith.constant 0 : index
    %c0_55 = arith.constant 0 : index
    %110 = vector.load %arg2[%c2_53, %c0_54, %c0_55] : memref<4x8x8xbf16, #tpu.memory_space<vmem>>, vector<1x8x8xbf16>
    %111 = vector.shape_cast %110 : vector<1x8x8xbf16> to vector<8x8xbf16>
    %112 = vector.extract_strided_slice %99 {offsets = [0, 192], sizes = [8, 96], strides = [1, 1]} : vector<8x384xbf16> to vector<8x96xbf16>
    %cst_56 = arith.constant dense<0.000000e+00> : vector<8x96xf32>
    %113 = tpu.matmul %111, %112, %cst_56 {dimension_numbers = #tpu.dot_dimension_numbers<[1], [0], [0], [1], [0, 0, 1, 1], [], []>} : vector<8x8xbf16>, vector<8x96xbf16>, vector<8x96xf32> -> vector<8x96xf32>
    %114 = arith.addf %109, %113 : vector<8x96xf32>
    %c3_57 = arith.constant 3 : index
    %c0_58 = arith.constant 0 : index
    %c0_59 = arith.constant 0 : index
    %115 = vector.load %arg2[%c3_57, %c0_58, %c0_59] : memref<4x8x8xbf16, #tpu.memory_space<vmem>>, vector<1x8x8xbf16>
    %116 = vector.shape_cast %115 : vector<1x8x8xbf16> to vector<8x8xbf16>
    %117 = vector.extract_strided_slice %99 {offsets = [0, 288], sizes = [8, 96], strides = [1, 1]} : vector<8x384xbf16> to vector<8x96xbf16>
    %cst_60 = arith.constant dense<0.000000e+00> : vector<8x96xf32>
    %118 = tpu.matmul %116, %117, %cst_60 {dimension_numbers = #tpu.dot_dimension_numbers<[1], [0], [0], [1], [0, 0, 1, 1], [], []>} : vector<8x8xbf16>, vector<8x96xbf16>, vector<8x96xf32> -> vector<8x96xf32>
    %119 = arith.addf %114, %118 : vector<8x96xf32>
    %cst_61 = arith.constant dense<0.000000e+00> : vector<8x96xf32>
    %120 = tpu.matmul %97, %2, %cst_61 {dimension_numbers = #tpu.dot_dimension_numbers<[1], [0], [0], [1], [0, 0, 1, 1], [], []>} : vector<8x32xbf16>, vector<32x96xbf16>, vector<8x96xf32> -> vector<8x96xf32>
    %121 = vector.extract_strided_slice %119 {offsets = [0, 0], sizes = [8, 64], strides = [1, 1]} : vector<8x96xf32> to vector<8x64xf32>
    %122 = vector.extract_strided_slice %120 {offsets = [0, 0], sizes = [8, 64], strides = [1, 1]} : vector<8x96xf32> to vector<8x64xf32>
    %123 = arith.addf %121, %122 : vector<8x64xf32>
    %124 = arith.negf %123 : vector<8x64xf32>
    %125 = math.exp %124 : vector<8x64xf32>
    %cst_62 = arith.constant 1.000000e+00 : f32
    %126 = vector.broadcast %cst_62 : f32 to vector<8x64xf32>
    %127 = arith.addf %126, %125 : vector<8x64xf32>
    %128 = arith.divf %126, %127 : vector<8x64xf32>
    %129 = vector.extract_strided_slice %128 {offsets = [0, 0], sizes = [8, 32], strides = [1, 1]} : vector<8x64xf32> to vector<8x32xf32>
    %130 = vector.extract_strided_slice %128 {offsets = [0, 32], sizes = [8, 32], strides = [1, 1]} : vector<8x64xf32> to vector<8x32xf32>
    %131 = vector.extract_strided_slice %119 {offsets = [0, 64], sizes = [8, 32], strides = [1, 1]} : vector<8x96xf32> to vector<8x32xf32>
    %132 = vector.extract_strided_slice %120 {offsets = [0, 64], sizes = [8, 32], strides = [1, 1]} : vector<8x96xf32> to vector<8x32xf32>
    %133 = arith.addf %132, %6 : vector<8x32xf32>
    %134 = arith.mulf %129, %133 : vector<8x32xf32>
    %135 = arith.addf %131, %134 : vector<8x32xf32>
    %136 = math.tanh %135 : vector<8x32xf32>
    %cst_63 = arith.constant 1.000000e+00 : f32
    %137 = vector.broadcast %cst_63 : f32 to vector<8x32xf32>
    %138 = arith.subf %137, %130 : vector<8x32xf32>
    %139 = arith.mulf %138, %136 : vector<8x32xf32>
    %140 = arith.mulf %130, %96 : vector<8x32xf32>
    %141 = arith.addf %139, %140 : vector<8x32xf32>
    %142 = arith.truncf %141 : vector<8x32xf32> to vector<8x32xbf16>
    %cst_64 = arith.constant dense<0.000000e+00> : vector<8x384xf32>
    %143 = tpu.matmul %142, %1, %cst_64 {dimension_numbers = #tpu.dot_dimension_numbers<[1], [0], [0], [1], [0, 0, 1, 1], [], []>} : vector<8x32xbf16>, vector<32x384xbf16>, vector<8x384xf32> -> vector<8x384xf32>
    %144 = arith.truncf %143 : vector<8x384xf32> to vector<8x384xbf16>
    %c0_65 = arith.constant 0 : index
    %c0_66 = arith.constant 0 : index
    %c0_67 = arith.constant 0 : index
    %145 = vector.load %arg2[%c0_65, %c0_66, %c0_67] : memref<4x8x8xbf16, #tpu.memory_space<vmem>>, vector<1x8x8xbf16>
    %146 = vector.shape_cast %145 : vector<1x8x8xbf16> to vector<8x8xbf16>
    %147 = vector.extract_strided_slice %144 {offsets = [0, 0], sizes = [8, 96], strides = [1, 1]} : vector<8x384xbf16> to vector<8x96xbf16>
    %cst_68 = arith.constant dense<0.000000e+00> : vector<8x96xf32>
    %148 = tpu.matmul %146, %147, %cst_68 {dimension_numbers = #tpu.dot_dimension_numbers<[1], [0], [0], [1], [0, 0, 1, 1], [], []>} : vector<8x8xbf16>, vector<8x96xbf16>, vector<8x96xf32> -> vector<8x96xf32>
    %149 = arith.addf %3, %148 : vector<8x96xf32>
    %c1_69 = arith.constant 1 : index
    %c0_70 = arith.constant 0 : index
    %c0_71 = arith.constant 0 : index
    %150 = vector.load %arg2[%c1_69, %c0_70, %c0_71] : memref<4x8x8xbf16, #tpu.memory_space<vmem>>, vector<1x8x8xbf16>
    %151 = vector.shape_cast %150 : vector<1x8x8xbf16> to vector<8x8xbf16>
    %152 = vector.extract_strided_slice %144 {offsets = [0, 96], sizes = [8, 96], strides = [1, 1]} : vector<8x384xbf16> to vector<8x96xbf16>
    %cst_72 = arith.constant dense<0.000000e+00> : vector<8x96xf32>
    %153 = tpu.matmul %151, %152, %cst_72 {dimension_numbers = #tpu.dot_dimension_numbers<[1], [0], [0], [1], [0, 0, 1, 1], [], []>} : vector<8x8xbf16>, vector<8x96xbf16>, vector<8x96xf32> -> vector<8x96xf32>
    %154 = arith.addf %149, %153 : vector<8x96xf32>
    %c2_73 = arith.constant 2 : index
    %c0_74 = arith.constant 0 : index
    %c0_75 = arith.constant 0 : index
    %155 = vector.load %arg2[%c2_73, %c0_74, %c0_75] : memref<4x8x8xbf16, #tpu.memory_space<vmem>>, vector<1x8x8xbf16>
    %156 = vector.shape_cast %155 : vector<1x8x8xbf16> to vector<8x8xbf16>
    %157 = vector.extract_strided_slice %144 {offsets = [0, 192], sizes = [8, 96], strides = [1, 1]} : vector<8x384xbf16> to vector<8x96xbf16>
    %cst_76 = arith.constant dense<0.000000e+00> : vector<8x96xf32>
    %158 = tpu.matmul %156, %157, %cst_76 {dimension_numbers = #tpu.dot_dimension_numbers<[1], [0], [0], [1], [0, 0, 1, 1], [], []>} : vector<8x8xbf16>, vector<8x96xbf16>, vector<8x96xf32> -> vector<8x96xf32>
    %159 = arith.addf %154, %158 : vector<8x96xf32>
    %c3_77 = arith.constant 3 : index
    %c0_78 = arith.constant 0 : index
    %c0_79 = arith.constant 0 : index
    %160 = vector.load %arg2[%c3_77, %c0_78, %c0_79] : memref<4x8x8xbf16, #tpu.memory_space<vmem>>, vector<1x8x8xbf16>
    %161 = vector.shape_cast %160 : vector<1x8x8xbf16> to vector<8x8xbf16>
    %162 = vector.extract_strided_slice %144 {offsets = [0, 288], sizes = [8, 96], strides = [1, 1]} : vector<8x384xbf16> to vector<8x96xbf16>
    %cst_80 = arith.constant dense<0.000000e+00> : vector<8x96xf32>
    %163 = tpu.matmul %161, %162, %cst_80 {dimension_numbers = #tpu.dot_dimension_numbers<[1], [0], [0], [1], [0, 0, 1, 1], [], []>} : vector<8x8xbf16>, vector<8x96xbf16>, vector<8x96xf32> -> vector<8x96xf32>
    %164 = arith.addf %159, %163 : vector<8x96xf32>
    %cst_81 = arith.constant dense<0.000000e+00> : vector<8x96xf32>
    %165 = tpu.matmul %142, %2, %cst_81 {dimension_numbers = #tpu.dot_dimension_numbers<[1], [0], [0], [1], [0, 0, 1, 1], [], []>} : vector<8x32xbf16>, vector<32x96xbf16>, vector<8x96xf32> -> vector<8x96xf32>
    %166 = vector.extract_strided_slice %164 {offsets = [0, 0], sizes = [8, 64], strides = [1, 1]} : vector<8x96xf32> to vector<8x64xf32>
    %167 = vector.extract_strided_slice %165 {offsets = [0, 0], sizes = [8, 64], strides = [1, 1]} : vector<8x96xf32> to vector<8x64xf32>
    %168 = arith.addf %166, %167 : vector<8x64xf32>
    %169 = arith.negf %168 : vector<8x64xf32>
    %170 = math.exp %169 : vector<8x64xf32>
    %cst_82 = arith.constant 1.000000e+00 : f32
    %171 = vector.broadcast %cst_82 : f32 to vector<8x64xf32>
    %172 = arith.addf %171, %170 : vector<8x64xf32>
    %173 = arith.divf %171, %172 : vector<8x64xf32>
    %174 = vector.extract_strided_slice %173 {offsets = [0, 0], sizes = [8, 32], strides = [1, 1]} : vector<8x64xf32> to vector<8x32xf32>
    %175 = vector.extract_strided_slice %173 {offsets = [0, 32], sizes = [8, 32], strides = [1, 1]} : vector<8x64xf32> to vector<8x32xf32>
    %176 = vector.extract_strided_slice %164 {offsets = [0, 64], sizes = [8, 32], strides = [1, 1]} : vector<8x96xf32> to vector<8x32xf32>
    %177 = vector.extract_strided_slice %165 {offsets = [0, 64], sizes = [8, 32], strides = [1, 1]} : vector<8x96xf32> to vector<8x32xf32>
    %178 = arith.addf %177, %6 : vector<8x32xf32>
    %179 = arith.mulf %174, %178 : vector<8x32xf32>
    %180 = arith.addf %176, %179 : vector<8x32xf32>
    %181 = math.tanh %180 : vector<8x32xf32>
    %cst_83 = arith.constant 1.000000e+00 : f32
    %182 = vector.broadcast %cst_83 : f32 to vector<8x32xf32>
    %183 = arith.subf %182, %175 : vector<8x32xf32>
    %184 = arith.mulf %183, %181 : vector<8x32xf32>
    %185 = arith.mulf %175, %141 : vector<8x32xf32>
    %186 = arith.addf %184, %185 : vector<8x32xf32>
    %187 = arith.truncf %186 : vector<8x32xf32> to vector<8x32xbf16>
    %cst_84 = arith.constant dense<0.000000e+00> : vector<8x384xf32>
    %188 = tpu.matmul %187, %1, %cst_84 {dimension_numbers = #tpu.dot_dimension_numbers<[1], [0], [0], [1], [0, 0, 1, 1], [], []>} : vector<8x32xbf16>, vector<32x384xbf16>, vector<8x384xf32> -> vector<8x384xf32>
    %189 = arith.truncf %188 : vector<8x384xf32> to vector<8x384xbf16>
    %c0_85 = arith.constant 0 : index
    %c0_86 = arith.constant 0 : index
    %c0_87 = arith.constant 0 : index
    %190 = vector.load %arg2[%c0_85, %c0_86, %c0_87] : memref<4x8x8xbf16, #tpu.memory_space<vmem>>, vector<1x8x8xbf16>
    %191 = vector.shape_cast %190 : vector<1x8x8xbf16> to vector<8x8xbf16>
    %192 = vector.extract_strided_slice %189 {offsets = [0, 0], sizes = [8, 96], strides = [1, 1]} : vector<8x384xbf16> to vector<8x96xbf16>
    %cst_88 = arith.constant dense<0.000000e+00> : vector<8x96xf32>
    %193 = tpu.matmul %191, %192, %cst_88 {dimension_numbers = #tpu.dot_dimension_numbers<[1], [0], [0], [1], [0, 0, 1, 1], [], []>} : vector<8x8xbf16>, vector<8x96xbf16>, vector<8x96xf32> -> vector<8x96xf32>
    %194 = arith.addf %3, %193 : vector<8x96xf32>
    %c1_89 = arith.constant 1 : index
    %c0_90 = arith.constant 0 : index
    %c0_91 = arith.constant 0 : index
    %195 = vector.load %arg2[%c1_89, %c0_90, %c0_91] : memref<4x8x8xbf16, #tpu.memory_space<vmem>>, vector<1x8x8xbf16>
    %196 = vector.shape_cast %195 : vector<1x8x8xbf16> to vector<8x8xbf16>
    %197 = vector.extract_strided_slice %189 {offsets = [0, 96], sizes = [8, 96], strides = [1, 1]} : vector<8x384xbf16> to vector<8x96xbf16>
    %cst_92 = arith.constant dense<0.000000e+00> : vector<8x96xf32>
    %198 = tpu.matmul %196, %197, %cst_92 {dimension_numbers = #tpu.dot_dimension_numbers<[1], [0], [0], [1], [0, 0, 1, 1], [], []>} : vector<8x8xbf16>, vector<8x96xbf16>, vector<8x96xf32> -> vector<8x96xf32>
    %199 = arith.addf %194, %198 : vector<8x96xf32>
    %c2_93 = arith.constant 2 : index
    %c0_94 = arith.constant 0 : index
    %c0_95 = arith.constant 0 : index
    %200 = vector.load %arg2[%c2_93, %c0_94, %c0_95] : memref<4x8x8xbf16, #tpu.memory_space<vmem>>, vector<1x8x8xbf16>
    %201 = vector.shape_cast %200 : vector<1x8x8xbf16> to vector<8x8xbf16>
    %202 = vector.extract_strided_slice %189 {offsets = [0, 192], sizes = [8, 96], strides = [1, 1]} : vector<8x384xbf16> to vector<8x96xbf16>
    %cst_96 = arith.constant dense<0.000000e+00> : vector<8x96xf32>
    %203 = tpu.matmul %201, %202, %cst_96 {dimension_numbers = #tpu.dot_dimension_numbers<[1], [0], [0], [1], [0, 0, 1, 1], [], []>} : vector<8x8xbf16>, vector<8x96xbf16>, vector<8x96xf32> -> vector<8x96xf32>
    %204 = arith.addf %199, %203 : vector<8x96xf32>
    %c3_97 = arith.constant 3 : index
    %c0_98 = arith.constant 0 : index
    %c0_99 = arith.constant 0 : index
    %205 = vector.load %arg2[%c3_97, %c0_98, %c0_99] : memref<4x8x8xbf16, #tpu.memory_space<vmem>>, vector<1x8x8xbf16>
    %206 = vector.shape_cast %205 : vector<1x8x8xbf16> to vector<8x8xbf16>
    %207 = vector.extract_strided_slice %189 {offsets = [0, 288], sizes = [8, 96], strides = [1, 1]} : vector<8x384xbf16> to vector<8x96xbf16>
    %cst_100 = arith.constant dense<0.000000e+00> : vector<8x96xf32>
    %208 = tpu.matmul %206, %207, %cst_100 {dimension_numbers = #tpu.dot_dimension_numbers<[1], [0], [0], [1], [0, 0, 1, 1], [], []>} : vector<8x8xbf16>, vector<8x96xbf16>, vector<8x96xf32> -> vector<8x96xf32>
    %209 = arith.addf %204, %208 : vector<8x96xf32>
    %cst_101 = arith.constant dense<0.000000e+00> : vector<8x96xf32>
    %210 = tpu.matmul %187, %2, %cst_101 {dimension_numbers = #tpu.dot_dimension_numbers<[1], [0], [0], [1], [0, 0, 1, 1], [], []>} : vector<8x32xbf16>, vector<32x96xbf16>, vector<8x96xf32> -> vector<8x96xf32>
    %211 = vector.extract_strided_slice %209 {offsets = [0, 0], sizes = [8, 64], strides = [1, 1]} : vector<8x96xf32> to vector<8x64xf32>
    %212 = vector.extract_strided_slice %210 {offsets = [0, 0], sizes = [8, 64], strides = [1, 1]} : vector<8x96xf32> to vector<8x64xf32>
    %213 = arith.addf %211, %212 : vector<8x64xf32>
    %214 = arith.negf %213 : vector<8x64xf32>
    %215 = math.exp %214 : vector<8x64xf32>
    %cst_102 = arith.constant 1.000000e+00 : f32
    %216 = vector.broadcast %cst_102 : f32 to vector<8x64xf32>
    %217 = arith.addf %216, %215 : vector<8x64xf32>
    %218 = arith.divf %216, %217 : vector<8x64xf32>
    %219 = vector.extract_strided_slice %218 {offsets = [0, 0], sizes = [8, 32], strides = [1, 1]} : vector<8x64xf32> to vector<8x32xf32>
    %220 = vector.extract_strided_slice %218 {offsets = [0, 32], sizes = [8, 32], strides = [1, 1]} : vector<8x64xf32> to vector<8x32xf32>
    %221 = vector.extract_strided_slice %209 {offsets = [0, 64], sizes = [8, 32], strides = [1, 1]} : vector<8x96xf32> to vector<8x32xf32>
    %222 = vector.extract_strided_slice %210 {offsets = [0, 64], sizes = [8, 32], strides = [1, 1]} : vector<8x96xf32> to vector<8x32xf32>
    %223 = arith.addf %222, %6 : vector<8x32xf32>
    %224 = arith.mulf %219, %223 : vector<8x32xf32>
    %225 = arith.addf %221, %224 : vector<8x32xf32>
    %226 = math.tanh %225 : vector<8x32xf32>
    %cst_103 = arith.constant 1.000000e+00 : f32
    %227 = vector.broadcast %cst_103 : f32 to vector<8x32xf32>
    %228 = arith.subf %227, %220 : vector<8x32xf32>
    %229 = arith.mulf %228, %226 : vector<8x32xf32>
    %230 = arith.mulf %220, %186 : vector<8x32xf32>
    %231 = arith.addf %229, %230 : vector<8x32xf32>
    %cst_104 = arith.constant 0.000000e+00 : f32
    %232 = vector.broadcast %cst_104 : f32 to vector<8x32xf32>
    %233 = arith.maximumf %231, %232 : vector<8x32xf32>
    %234 = arith.truncf %233 : vector<8x32xf32> to vector<8x32xbf16>
    %c0_105 = arith.constant 0 : index
    %c0_106 = arith.constant 0 : index
    %235 = vector.load %arg7[%c0_105, %c0_106] : memref<2x8xbf16, #tpu.memory_space<vmem>>, vector<2x8xbf16>
    %cst_107 = arith.constant dense<0.000000e+00> : vector<2x32xf32>
    %236 = tpu.matmul %235, %234, %cst_107 {dimension_numbers = #tpu.dot_dimension_numbers<[1], [0], [0], [1], [0, 0, 1, 1], [], []>} : vector<2x8xbf16>, vector<8x32xbf16>, vector<2x32xf32> -> vector<2x32xf32>
    %c0_108 = arith.constant 0 : index
    %c480 = arith.constant 480 : index
    %237 = vector.load %arg4[%c0_108, %c480] : memref<32x736xbf16, #tpu.memory_space<vmem>>, vector<32x32xbf16>
    %c0_109 = arith.constant 0 : index
    %c512 = arith.constant 512 : index
    %238 = vector.load %arg4[%c0_109, %c512] : memref<32x736xbf16, #tpu.memory_space<vmem>>, vector<32x32xbf16>
    %c0_110 = arith.constant 0 : index
    %c544 = arith.constant 544 : index
    %239 = vector.load %arg4[%c0_110, %c544] : memref<32x736xbf16, #tpu.memory_space<vmem>>, vector<32x128xbf16>
    %c0_111 = arith.constant 0 : index
    %c32 = arith.constant 32 : index
    %240 = vector.load %arg6[%c0_111, %c32] : memref<1x288xf32, #tpu.memory_space<vmem>>, vector<1x32xf32>
    %c0_112 = arith.constant 0 : index
    %c64 = arith.constant 64 : index
    %241 = vector.load %arg6[%c0_112, %c64] : memref<1x288xf32, #tpu.memory_space<vmem>>, vector<1x32xf32>
    %c0_113 = arith.constant 0 : index
    %c96 = arith.constant 96 : index
    %242 = vector.load %arg6[%c0_113, %c96] : memref<1x288xf32, #tpu.memory_space<vmem>>, vector<1x128xf32>
    %243 = arith.truncf %236 : vector<2x32xf32> to vector<2x32xbf16>
    %cst_114 = arith.constant dense<0.000000e+00> : vector<2x32xf32>
    %244 = tpu.matmul %243, %237, %cst_114 {dimension_numbers = #tpu.dot_dimension_numbers<[1], [0], [0], [1], [0, 0, 1, 1], [], []>} : vector<2x32xbf16>, vector<32x32xbf16>, vector<2x32xf32> -> vector<2x32xf32>
    %245 = vector.broadcast %240 : vector<1x32xf32> to vector<2x32xf32>
    %246 = arith.addf %244, %245 : vector<2x32xf32>
    %247 = math.tanh %246 : vector<2x32xf32>
    %248 = arith.truncf %247 : vector<2x32xf32> to vector<2x32xbf16>
    %cst_115 = arith.constant dense<0.000000e+00> : vector<2x32xf32>
    %249 = tpu.matmul %248, %238, %cst_115 {dimension_numbers = #tpu.dot_dimension_numbers<[1], [0], [0], [1], [0, 0, 1, 1], [], []>} : vector<2x32xbf16>, vector<32x32xbf16>, vector<2x32xf32> -> vector<2x32xf32>
    %250 = vector.broadcast %241 : vector<1x32xf32> to vector<2x32xf32>
    %251 = arith.addf %249, %250 : vector<2x32xf32>
    %252 = math.tanh %251 : vector<2x32xf32>
    %253 = arith.truncf %252 : vector<2x32xf32> to vector<2x32xbf16>
    %cst_116 = arith.constant dense<0.000000e+00> : vector<2x128xf32>
    %254 = tpu.matmul %253, %239, %cst_116 {dimension_numbers = #tpu.dot_dimension_numbers<[1], [0], [0], [1], [0, 0, 1, 1], [], []>} : vector<2x32xbf16>, vector<32x128xbf16>, vector<2x128xf32> -> vector<2x128xf32>
    %255 = vector.broadcast %242 : vector<1x128xf32> to vector<2x128xf32>
    %256 = arith.addf %254, %255 : vector<2x128xf32>
    %c0_117 = arith.constant 0 : index
    %c672 = arith.constant 672 : index
    %257 = vector.load %arg4[%c0_117, %c672] : memref<32x736xbf16, #tpu.memory_space<vmem>>, vector<32x64xbf16>
    %c0_118 = arith.constant 0 : index
    %c0_119 = arith.constant 0 : index
    %258 = vector.load %arg5[%c0_118, %c0_119] : memref<64x66xbf16, #tpu.memory_space<vmem>>, vector<64x64xbf16>
    %c0_120 = arith.constant 0 : index
    %c64_121 = arith.constant 64 : index
    %259 = vector.load %arg5[%c0_120, %c64_121] : memref<64x66xbf16, #tpu.memory_space<vmem>>, vector<64x2xbf16>
    %c0_122 = arith.constant 0 : index
    %c224 = arith.constant 224 : index
    %260 = vector.load %arg6[%c0_122, %c224] : memref<1x288xf32, #tpu.memory_space<vmem>>, vector<1x64xf32>
    %cst_123 = arith.constant dense<0.000000e+00> : vector<8x64xf32>
    %261 = tpu.matmul %234, %257, %cst_123 {dimension_numbers = #tpu.dot_dimension_numbers<[1], [0], [0], [1], [0, 0, 1, 1], [], []>} : vector<8x32xbf16>, vector<32x64xbf16>, vector<8x64xf32> -> vector<8x64xf32>
    %c0_124 = arith.constant 0 : index
    %c0_125 = arith.constant 0 : index
    %262 = vector.load %arg9[%c0_124, %c0_125] : memref<8x64xf32, #tpu.memory_space<vmem>>, vector<8x64xf32>
    %263 = arith.addf %261, %262 : vector<8x64xf32>
    %264 = math.tanh %263 : vector<8x64xf32>
    %265 = arith.truncf %264 : vector<8x64xf32> to vector<8x64xbf16>
    %cst_126 = arith.constant dense<0.000000e+00> : vector<8x64xf32>
    %266 = tpu.matmul %265, %258, %cst_126 {dimension_numbers = #tpu.dot_dimension_numbers<[1], [0], [0], [1], [0, 0, 1, 1], [], []>} : vector<8x64xbf16>, vector<64x64xbf16>, vector<8x64xf32> -> vector<8x64xf32>
    %267 = vector.broadcast %260 : vector<1x64xf32> to vector<8x64xf32>
    %268 = arith.addf %266, %267 : vector<8x64xf32>
    %269 = math.tanh %268 : vector<8x64xf32>
    %270 = arith.truncf %269 : vector<8x64xf32> to vector<8x64xbf16>
    %cst_127 = arith.constant dense<0.000000e+00> : vector<8x2xf32>
    %271 = tpu.matmul %270, %259, %cst_127 {dimension_numbers = #tpu.dot_dimension_numbers<[1], [0], [0], [1], [0, 0, 1, 1], [], []>} : vector<8x64xbf16>, vector<64x2xbf16>, vector<8x2xf32> -> vector<8x2xf32>
    %272 = vector.extract_strided_slice %271 {offsets = [0, 0], sizes = [8, 1], strides = [1, 1]} : vector<8x2xf32> to vector<8x1xf32>
    %273 = arith.truncf %272 : vector<8x1xf32> to vector<8x1xbf16>
    %c0_128 = arith.constant 0 : index
    %c0_129 = arith.constant 0 : index
    %274 = vector.load %arg10[%c0_128, %c0_129] : memref<8x128xbf16, #tpu.memory_space<vmem>>, vector<8x128xbf16>
    %275 = vector.broadcast %273 : vector<8x1xbf16> to vector<8x128xbf16>
    %276 = arith.mulf %275, %274 : vector<8x128xbf16>
    %277 = vector.extract_strided_slice %271 {offsets = [0, 1], sizes = [8, 1], strides = [1, 1]} : vector<8x2xf32> to vector<8x1xf32>
    %278 = arith.truncf %277 : vector<8x1xf32> to vector<8x1xbf16>
    %c0_130 = arith.constant 0 : index
    %c0_131 = arith.constant 0 : index
    %279 = vector.load %arg11[%c0_130, %c0_131] : memref<8x128xbf16, #tpu.memory_space<vmem>>, vector<8x128xbf16>
    %280 = vector.broadcast %278 : vector<8x1xbf16> to vector<8x128xbf16>
    %281 = arith.mulf %280, %279 : vector<8x128xbf16>
    %282 = arith.addf %276, %281 : vector<8x128xbf16>
    %c0_132 = arith.constant 0 : index
    %c0_133 = arith.constant 0 : index
    %283 = vector.load %arg8[%c0_132, %c0_133] : memref<2x8xbf16, #tpu.memory_space<vmem>>, vector<2x8xbf16>
    %cst_134 = arith.constant dense<0.000000e+00> : vector<2x128xf32>
    %284 = tpu.matmul %283, %282, %cst_134 {dimension_numbers = #tpu.dot_dimension_numbers<[1], [0], [0], [1], [0, 0, 1, 1], [], []>} : vector<2x8xbf16>, vector<8x128xbf16>, vector<2x128xf32> -> vector<2x128xf32>
    %285 = arith.addf %256, %284 : vector<2x128xf32>
    %c0_135 = arith.constant 0 : index
    %c0_136 = arith.constant 0 : index
    %286 = vector.load %arg12[%c0_135, %c0_136] : memref<2x128xf32, #tpu.memory_space<vmem>>, vector<2x128xf32>
    %287 = arith.addf %285, %286 : vector<2x128xf32>
    %cst_137 = arith.constant dense<0xFF800000> : vector<2xf32>
    %288 = vector.multi_reduction <maximumf>, %287, %cst_137 [1] : vector<2x128xf32> to vector<2xf32>
    %289 = vector.shape_cast %288 : vector<2xf32> to vector<2x1xf32>
    %290 = vector.broadcast %289 : vector<2x1xf32> to vector<2x128xf32>
    %291 = arith.subf %287, %290 : vector<2x128xf32>
    %292 = math.exp %291 : vector<2x128xf32>
    %cst_138 = arith.constant dense<0.000000e+00> : vector<2xf32>
    %293 = vector.multi_reduction <add>, %292, %cst_138 [1] : vector<2x128xf32> to vector<2xf32>
    %294 = vector.shape_cast %293 : vector<2xf32> to vector<2x1xf32>
    %295 = tpu.reciprocal %294 {approx = true} : vector<2x1xf32> -> vector<2x1xf32>
    %296 = vector.broadcast %295 : vector<2x1xf32> to vector<2x128xf32>
    %297 = arith.mulf %292, %296 : vector<2x128xf32>
    %c0_139 = arith.constant 0 : index
    %c0_140 = arith.constant 0 : index
    %298 = vector.load %arg13[%c0_139, %c0_140] : memref<2x128xf32, #tpu.memory_space<vmem>>, vector<2x128xf32>
    tpu.vector_store %arg13[%c0_139, %c0_140], %297 {strides = array<i32>} : memref<2x128xf32, #tpu.memory_space<vmem>>, vector<2x128xf32>,
    return
  }
  func.func @transform_0(%arg0: i32) -> (i32, i32) {
    %c0_i32 = arith.constant 0 : i32
    %c0_i32_0 = arith.constant 0 : i32
    %c0_i32_1 = arith.constant 0 : i32
    return %c0_i32, %c0_i32_0 : i32, i32
  }
  func.func @transform_1(%arg0: i32) -> (i32, i32, i32) {
    %c0_i32 = arith.constant 0 : i32
    %c0_i32_0 = arith.constant 0 : i32
    %c0_i32_1 = arith.constant 0 : i32
    %c0_i32_2 = arith.constant 0 : i32
    return %c0_i32, %c0_i32_0, %c0_i32_1 : i32, i32, i32
  }
  func.func @transform_2(%arg0: i32) -> (i32, i32) {
    %c0_i32 = arith.constant 0 : i32
    %c0_i32_0 = arith.constant 0 : i32
    %c0_i32_1 = arith.constant 0 : i32
    return %c0_i32, %c0_i32_0 : i32, i32
  }
  func.func @transform_3(%arg0: i32) -> (i32, i32) {
    %c0_i32 = arith.constant 0 : i32
    %c0_i32_0 = arith.constant 0 : i32
    %c0_i32_1 = arith.constant 0 : i32
    return %c0_i32, %c0_i32_0 : i32, i32
  }
  func.func @transform_4(%arg0: i32) -> (i32, i32) {
    %c0_i32 = arith.constant 0 : i32
    %c0_i32_0 = arith.constant 0 : i32
    %c0_i32_1 = arith.constant 0 : i32
    return %c0_i32, %c0_i32_0 : i32, i32
  }
  func.func @transform_5(%arg0: i32) -> (i32, i32) {
    %c0_i32 = arith.constant 0 : i32
    %c0_i32_0 = arith.constant 0 : i32
    %c0_i32_1 = arith.constant 0 : i32
    return %c0_i32, %c0_i32_0 : i32, i32
  }
  func.func @transform_6(%arg0: i32) -> (i32, i32) {
    %c0_i32 = arith.constant 0 : i32
    %c0_i32_0 = arith.constant 0 : i32
    %c0_i32_1 = arith.constant 0 : i32
    return %c0_i32, %c0_i32_0 : i32, i32
  }
  func.func @transform_7(%arg0: i32) -> (i32, i32) {
    %c0_i32 = arith.constant 0 : i32
    %c0_i32_0 = arith.constant 0 : i32
    %c0_i32_1 = arith.constant 0 : i32
    return %c0_i32, %c0_i32_0 : i32, i32
  }
  func.func @transform_8(%arg0: i32) -> (i32, i32) {
    %c0_i32 = arith.constant 0 : i32
    %c0_i32_0 = arith.constant 0 : i32
    %c0_i32_1 = arith.constant 0 : i32
    return %c0_i32, %c0_i32_0 : i32, i32
  }
  func.func @transform_9(%arg0: i32) -> (i32, i32) {
    %c0_i32 = arith.constant 0 : i32
    %c0_i32_0 = arith.constant 0 : i32
    %c0_i32_1 = arith.constant 0 : i32
    return %c0_i32, %c0_i32_0 : i32, i32
  }
  func.func @transform_10(%arg0: i32) -> (i32, i32) {
    %c0_i32 = arith.constant 0 : i32
    %c0_i32_0 = arith.constant 0 : i32
    %c0_i32_1 = arith.constant 0 : i32
    return %c0_i32, %c0_i32_0 : i32, i32
  }
  func.func @transform_11(%arg0: i32) -> (i32, i32) {
    %c0_i32 = arith.constant 0 : i32
    %c0_i32_0 = arith.constant 0 : i32
    %c0_i32_1 = arith.constant 0 : i32
    return %c0_i32, %c0_i32_0 : i32, i32
  }
  func.func @transform_12(%arg0: i32) -> (i32, i32) {
    %c0_i32 = arith.constant 0 : i32
    %c0_i32_0 = arith.constant 0 : i32
    %c0_i32_1 = arith.constant 0 : i32
    return %c0_i32, %c0_i32_0 : i32, i32
  }
}

</mosaic_0001>

<bundles_post_ra>
// kernel: tpu_custom_call.1
= control target key start
LH: loop header
LB: loop body
LE: loop exit
PB: predicated region body
PF: predicated region fallthrough
CT: control target
= control target key end

     0   :  { %17 = vsyncpa [#allocation3], 0  ;;  %s3817_s0 = inlined_call_operand.hbm [shape: f32[8,32], index: 0, kind: input, shape index: {}]   ;;  %s3818_s1 = inlined_call_operand.hbm [shape: bf16[4,8,8], index: 1, kind: input, shape index: {}]   ;;  %s3819_s2 = inlined_call_operand.hbm [shape: f32[8,96], index: 2, kind: input, shape index: {}]   ;;  %s3820_s3 = inlined_call_operand.hbm [shape: bf16[32,736], index: 3, kind: input, shape index: {}]   ;;  %s3821_s4 = inlined_call_operand.hbm [shape: bf16[64,66], index: 4, kind: input, shape index: {}]   ;;  %s3822_s5 = inlined_call_operand.hbm [shape: f32[1,288], index: 5, kind: input, shape index: {}]   ;;  %s3823_s6 = inlined_call_operand.hbm [shape: bf16[2,8], index: 6, kind: input, shape index: {}]   ;;  %s3824_s7 = inlined_call_operand.hbm [shape: bf16[2,8], index: 7, kind: input, shape index: {}]   ;;  %s3825_s8 = inlined_call_operand.vmem [shape: f32[8,64], index: 8, kind: input, shape index: {}]   ;;  %s3826_s9 = inlined_call_operand.vmem [shape: bf16[8,128], index: 9, kind: input, shape index: {}]   ;;  %s3827_s10 = inlined_call_operand.vmem [shape: bf16[8,128], index: 10, kind: input, shape index: {}]   ;;  %s3828_s11 = inlined_call_operand.vmem [shape: f32[2,128], index: 11, kind: input, shape index: {}]   ;;  %s3829_s12 = inlined_call_operand.hbm [shape: f32[2,128], index: 12, kind: output, shape index: {}]  }
   0x1   :  { %18 = vsyncpa [#allocation6], 0 }
   0x2   :  { %19 = vsyncpa [#allocation9], 0 }
   0x3   :  { %20 = vsyncpa [#allocation12], 0 }
   0x4   :  { %21 = vsyncpa [#allocation15], 0 }
   0x5   :  { %22 = vsyncpa [#allocation4], 0  ;;  %s3264_s21 = smov [#allocation5]  }
   0x6   :  { %s38_s22 = sshll.u32 %s3264_s21, 4  ;;  %s39_s22 = int_to_ptr.vmem [resolvable:$true] %s38_s22 }
   0x7   :  { %s3080_s23 = scalar_lea.vmem %s39_s22, 256  ;;  %p3085_p1 = scmp.lt.s32.totalorder %s39_s22, %s39_s22 }
   0x8   :  { %p3081_p0 = scmp.ne.s32.totalorder %s39_s22, %s3080_s23  ;;  %p3086_p2 = scmp.lt.s32.totalorder %s3080_s23, %s3080_s23 }
   0xa   :  { %p3087_p3 = por %p3086_p2, %p3085_p1 }
   0xc   :  { %p3088_p4 = pnand %p3087_p3, %p3081_p0 }
   0xe   :  { %3091 = shalt.err (!%p3088_p4)
}
   0xf   :  { %s3265_s24 = smov 64   ;;  %s3266_s25 = smov 4  }
  0x10   :  { %44 = dma.hbm_to_vmem [thread:$0]  %s3818_s1, 256, %s39_s22, [#allocation6], %s3265_s24, %s3265_s24, %s3266_s25  }
  0x11   :  { %s3267_s28 = smov [#allocation8]  }
  0x12   :  { %s60_s29 = sshll.u32 %s3267_s28, 4  ;;  %s61_s29 = int_to_ptr.vmem [resolvable:$true] %s60_s29 }
  0x13   :  { %s3100_s30 = scalar_lea.vmem %s61_s29, 1536  ;;  %p3105_p6 = scmp.lt.s32.totalorder %s61_s29, %s61_s29 }
  0x14   :  { %p3101_p5 = scmp.ne.s32.totalorder %s61_s29, %s3100_s30  ;;  %p3106_p7 = scmp.lt.s32.totalorder %s3100_s30, %s3100_s30 }
  0x16   :  { %p3107_p8 = por %p3106_p7, %p3105_p6 }
  0x18   :  { %p3108_p9 = pnand %p3107_p8, %p3101_p5 }
  0x1a   :  { %3111 = shalt.err (!%p3108_p9)
}
  0x1b   :  { %s3268_s13 = smov 384   ;;  %s3269_s14 = smov 24  }
  0x1c   :  { %66 = dma.hbm_to_vmem [thread:$0]  %s3820_s3, 1536, %s61_s29, [#allocation9], %s3268_s13, %s3268_s13, %s3269_s14  }
  0x1d   :  { %s3270_s17 = smov [#allocation11]   ;;  %s3271_s19 = smov [#allocation2]  }
  0x1e   :  { %s85_s18 = sshll.u32 %s3270_s17, 4  ;;  %s29_s1 = sshll.u32 %s3271_s19, 4  ;;  %s86_s18 = int_to_ptr.vmem [resolvable:$true] %s85_s18  ;;  %s30_s1 = int_to_ptr.vmem [resolvable:$true] %s29_s1 }
  0x1f   :  { %s3120_s20 = scalar_lea.vmem %s86_s18, 48  ;;  %s3124_s21 = scalar_lea.vmem %s86_s18, 64 }
  0x20   :  { %p3121_p10 = scmp.ne.s32.totalorder %s86_s18, %s3120_s20  ;;  %p3125_p11 = scmp.lt.s32.totalorder %s86_s18, %s86_s18 }
  0x21   :  { %p3126_p12 = scmp.lt.s32.totalorder %s3124_s21, %s3120_s20 }
  0x23   :  { %p3127_p13 = por %p3126_p12, %p3125_p11 }
  0x25   :  { %p3128_p0 = pnand %p3127_p13, %p3121_p10 }
  0x27   :  { %3131 = shalt.err (!%p3128_p0)
}
  0x28   :  { %88 = dma.hbm_to_vmem [thread:$0]  %s3822_s5, 48, %s86_s18, [#allocation12]  }
  0x29   :  { %s3140_s26 = scalar_lea.vmem %s30_s1, 128  ;;  %p3145_p2 = scmp.lt.s32.totalorder %s30_s1, %s30_s1 }
  0x2a   :  { %p3141_p1 = scmp.ne.s32.totalorder %s30_s1, %s3140_s26  ;;  %p3146_p3 = scmp.lt.s32.totalorder %s3140_s26, %s3140_s26 }
  0x2c   :  { %p3147_p4 = por %p3146_p3, %p3145_p2 }
  0x2e   :  { %p3148_p5 = pnand %p3147_p4, %p3141_p1 }
  0x30   :  { %3151 = shalt.err (!%p3148_p5)
}
  0x31   :  { %32 = dma.hbm_to_vmem [thread:$0]  %s3817_s0, 128, %s30_s1, [#allocation3]  }
  0x32   :  { %s3272_s28 = smov [#allocation7]   ;;  %s3273_s30 = smov [#allocation10]  }
  0x33   :  { %s51_s29 = sshll.u32 %s3272_s28, 4  ;;  %s72_s13 = sshll.u32 %s3273_s30, 4  ;;  %s52_s29 = int_to_ptr.vmem [resolvable:$true] %s51_s29  ;;  %s73_s13 = int_to_ptr.vmem [resolvable:$true] %s72_s13 }
  0x34   :  { %s3160_s14 = scalar_lea.vmem %s52_s29, 128  ;;  %p3165_p7 = scmp.lt.s32.totalorder %s52_s29, %s52_s29 }
  0x35   :  { %p3161_p6 = scmp.ne.s32.totalorder %s52_s29, %s3160_s14  ;;  %p3166_p8 = scmp.lt.s32.totalorder %s3160_s14, %s3160_s14 }
  0x37   :  { %p3167_p9 = por %p3166_p8, %p3165_p7 }
  0x39   :  { %p3168_p10 = pnand %p3167_p9, %p3161_p6 }
  0x3b   :  { %3171 = shalt.err (!%p3168_p10)
}
  0x3c   :  { %54 = dma.hbm_to_vmem [thread:$0]  %s3819_s2, 128, %s52_s29, [#allocation6]  }
  0x3d   :  { %s3180_s16 = scalar_lea.vmem %s73_s13, 512  ;;  %p3185_p12 = scmp.lt.s32.totalorder %s73_s13, %s73_s13 }
  0x3e   :  { %p3181_p11 = scmp.ne.s32.totalorder %s73_s13, %s3180_s16  ;;  %p3186_p13 = scmp.lt.s32.totalorder %s3180_s16, %s3180_s16 }
  0x40   :  { %p3187_p0 = por %p3186_p13, %p3185_p12 }
  0x42   :  { %p3188_p1 = pnand %p3187_p0, %p3181_p11 }
  0x44   :  { %3191 = shalt.err (!%p3188_p1)
}
  0x45   :  { %78 = dma.hbm_to_vmem [thread:$0]  %s3821_s4, 512, %s73_s13, [#allocation9], %s3265_s24, %s3265_s24, %s3266_s25  }
  0x46   :  { %s3274_s18 = smov [#allocation13]   ;;  %s3275_s1 = smov [#allocation14]  }
  0x47   :  { %s95_s19 = sshll.u32 %s3274_s18, 4  ;;  %s105_s20 = sshll.u32 %s3275_s1, 4  ;;  %s96_s19 = int_to_ptr.vmem [resolvable:$true] %s95_s19  ;;  %s106_s20 = int_to_ptr.vmem [resolvable:$true] %s105_s20 }
  0x48   :  { %s3200_s2 = scalar_lea.vmem %s96_s19, 16  ;;  %s3204_s21 = scalar_lea.vmem %s96_s19, 32 }
  0x49   :  { %p3201_p2 = scmp.ne.s32.totalorder %s96_s19, %s3200_s2  ;;  %p3205_p3 = scmp.lt.s32.totalorder %s96_s19, %s96_s19 }
  0x4a   :  { %p3206_p4 = scmp.lt.s32.totalorder %s3204_s21, %s3200_s2 }
  0x4c   :  { %p3207_p5 = por %p3206_p4, %p3205_p3 }
  0x4e   :  { %p3208_p6 = pnand %p3207_p5, %p3201_p2 }
  0x50   :  { %3211 = shalt.err (!%p3208_p6)
}
  0x51   :  { %98 = dma.hbm_to_vmem [thread:$0]  %s3823_s6, 16, %s96_s19, [#allocation12]  }
  0x52   :  { %s3220_s26 = scalar_lea.vmem %s106_s20, 16  ;;  %s3224_s4 = scalar_lea.vmem %s106_s20, 32 }
  0x53   :  { %p3221_p7 = scmp.ne.s32.totalorder %s106_s20, %s3220_s26  ;;  %p3225_p8 = scmp.lt.s32.totalorder %s106_s20, %s106_s20 }
  0x54   :  { %p3226_p9 = scmp.lt.s32.totalorder %s3224_s4, %s3220_s26 }
  0x56   :  { %p3227_p10 = por %p3226_p9, %p3225_p8 }
  0x58   :  { %p3228_p11 = pnand %p3227_p10, %p3221_p7 }
  0x5a   :  { %3231 = shalt.err (!%p3228_p11)
}
  0x5b   :  { %108 = dma.hbm_to_vmem [thread:$0]  %s3824_s7, 16, %s106_s20, [#allocation15]  }
  0x5c   :  { %3252 = dma.done.wait [#allocation3], 128  }
  0x5d   :  { %3253 = vsyncadd [#allocation3], 4294967168 }
  0x5e   :  { %3254 = dma.done.wait [#allocation6], 384  }
  0x5f   :  { %3255 = vsyncadd [#allocation6], 4294966912 }
  0x60   :  { %3256 = dma.done.wait [#allocation9], 2048  }
  0x61   :  { %3257 = vsyncadd [#allocation9], 4294965248 }
  0x62   :  { %3258 = dma.done.wait [#allocation12], 64  }
  0x63   :  { %3259 = vsyncadd [#allocation12], 4294967232 }
  0x64   :  { %3260 = dma.done.wait [#allocation15], 16  }
  0x65   :  { %3261 = vsyncadd [#allocation15], 4294967280  ;;  %v3276_v0 = vmov 0.0   ;;  %v3277_v1 = vmov 0   ;;  %vm3278_vm0 = vmmov 0   ;;  %v3398_v8 = vld [vmem:[#allocation2] sm:$0xff] }
  0x66   :  { %2715 = vmatprep.subr.bf16.mxu1 %v3276_v0  ;;  %231 = vmatprep.mubr.bf16.mxu0 %v3277_v1  ;;  %v3383_v2 = vld [vmem:[#allocation8 + $0x34] ss:$24 sps:$4 sm:$0xff]   ;;  %v3385_v3 = vld [vmem:[#allocation8 + $0x30] ss:$24 sps:$4 sm:$0xff]   ;;  %v3391_v5 = vld [vmem:[#allocation8 + $0x4] ss:$24 sps:$4 sm:$0xff]   ;;  %v3404_v9 = vpack.c.bf16 %v3398_v8, %v3398_v8 }
  0x67   :  { %2719 = vmatprep.mubr.msk.bf16.mxu1 %vm3278_vm0, %v3276_v0  ;;  %3002 = vset.pattern.permute.xlu0 %v3277_v1  ;;  %v3388_v4 = vld [vmem:[#allocation8 + $0x38] ss:$24 sps:$4 sm:$0xff]   ;;  %v3396_v7 = vld [vmem:[#allocation8 + $0x8] ss:$24 sps:$4 sm:$0xff]   ;;  %vm195_vm1 = vcmask 261120   ;;  %vm288_vm2 = vcmask 1043456  }
  0x68   :  { %211 = vmatprep.subr.bf16.mxu0 %v3383_v2  ;;  %v3393_v6 = vld [vmem:[#allocation8] ss:$24 sps:$4 sm:$0xff]   ;;  %2716 = vmatpush3.bf16.msra.mxu1 %v3388_v4  ;;  %s3279_s6 = smov 32   ;;  %v3420_v18 = vld [vmem:[#allocation5] sm:$0xf]  ;;  %vm284_vm3 = vcmask 64512  }
  0x69   :  { %212 = vmatpush1.bf16.msra.mxu0 %v3385_v3  ;;  %2717 = vmatprep.subr.bf16.mxu1 %v3276_v0  ;;  %v2550_v23 = vld [vmem:[#allocation11] ss:$0 sm:$0xff]  ;;  %s3280_s7 = smov 96   ;;  %vm397_vm4 = vcmask 523264   ;;  %v3435_v31 = vld [vmem:[#allocation5 + $0x4] sm:$0xf] }
  0x6a   :  { %213 = vmatprep.subr.bf16.mxu0 %v3391_v5  ;;  %v3439_v33 = vld [vmem:[#allocation5 + $0x8] sm:$0xf]  ;;  %v3441_v34 = vld [vmem:[#allocation8 + $0x3c] ss:$24 sps:$4 sm:$0xff]   ;;  %v3452_v37 = vld [vmem:[#allocation8 + $0xc] ss:$24 sps:$4 sm:$0xff]  }
  0x6b   :  { %v3458_v38 = vld [vmem:[#allocation5 + $0xc] sm:$0xf]  ;;  %v3477_v43 = vld [vmem:[#allocation7] sm:$0xff]  ;;  %vm2185_vm5 = vcmask 785408   ;;  %vm2518_vm6 = vcmask 1041408  }
  0x6c   :  { %2718 = vmatpush3.bf16.msra.mxu1 %v3396_v7 }
  0x6d   :  { %214 = vmatpush1.bf16.msra.mxu0 %v3393_v6  ;;  %2729 = vmatprep.subr.bf16.mxu1 %v3276_v0 }
  0x6e   :  { %2723 = vmatprep.subr.bf16.mxu0 %v3276_v0 }
  0x6f   :  { %2720 = vmatmul.mubr.msk.bf16.vlgmr.msra.gmra.mxu1 %vm195_vm1, %v3404_v9 }
  0x70   :  { %2557 = vmatmul.mubr.msk.bf16.vlgmr.msra.gmra.mxu0 %vm195_vm1, %v3404_v9  ;;  %2731 = vmatprep.mubr.msk.bf16.mxu1 %vm3278_vm0, %v3276_v0 }
  0x71   :  { %2725 = vmatprep.mubr.msk.bf16.mxu0 %vm3278_vm0, %v3276_v0 }
 0x12f   :  { %v274_v12 = vpop.f32.mrf.mxu1 }
 0x130   :  { %v233_v10 = vpop.f32.mrf.mxu0  ;;  %v282_v19 = vpack.c.bf16 %v274_v12, %v274_v12 }
 0x131   :  { %v280_v11 = vpack.c.bf16 %v233_v10, %v233_v10  ;;  %v2721_v16 = vpop.f32.mrf.mxu1 }
 0x132   :  { %v235_v13 = vpop.f32.mrf.mxu0 }
 0x133   :  { %v290_v14 = vsel %vm288_vm2, %v280_v11, 0  ;;  %v281_v15 = vpack.c.bf16 %v235_v13, %v235_v13  ;;  %337 = vrot.lane.b32.xlu1 %v280_v11, %s3279_s6  ;;  %v277_v20 = vpop.f32.mrf.mxu1 }
 0x134   :  { %v237_v17 = vpop.f32.mrf.mxu0  ;;  %2724 = vmatpush3.bf16.msra.mxu0 %v290_v14 }
 0x135   :  { %393 = vrot.lane.b32.xlu0 %v281_v15, %s3265_s24  ;;  %2735 = vmatprep.subr.bf16.mxu0 %v3276_v0  ;;  %v2722_v22 = vpop.f32.mrf.mxu1 }
 0x136   :  { %v238_v21 = vpop.f32.mrf.mxu0 }
 0x137   :  { %339 = vrot.lane.b32.xlu1 %v281_v15, %s3279_s6  ;;  %2726 = vmatmul.mubr.msk.bf16.vlgmr.msra.gmra.mxu0 %vm284_vm3, %v3420_v18 }
 0x138   :  { %2737 = vmatprep.mubr.msk.bf16.mxu0 %vm3278_vm0, %v3276_v0 }
 0x139   :  { %395 = vrot.lane.b32.xlu0 %v282_v19, %s3265_s24 }
 0x13b   :  { %556 = vrot.lane.b32.xlu1 %v2550_v23, %s3265_s24 }
 0x13d   :  { %448 = vrot.lane.b32.xlu0 %v282_v19, %s3280_s7 }
 0x1a5   :  { %v338_v24 = vpop.permute.xlu1 %337 }
 0x1a7   :  { %v394_v25 = vpop.permute.xlu0 %393 }
 0x1a9   :  { %v340_v26 = vpop.permute.xlu1 %339 }
 0x1aa   :  { %v342_v27 = vsel %vm195_vm1, %v338_v24, %v340_v26 }
 0x1ab   :  { %v347_v28 = vsel %vm288_vm2, %v342_v27, 0  ;;  %v396_v29 = vpop.permute.xlu0 %395 }
 0x1ac   :  { %v398_v30 = vsel %vm397_vm4, %v394_v25, %v396_v29  ;;  %2730 = vmatpush3.bf16.msra.mxu1 %v347_v28 }
 0x1ad   :  { %v403_v32 = vsel %vm288_vm2, %v398_v30, 0  ;;  %2741 = vmatprep.subr.bf16.mxu1 %v3276_v0  ;;  %v3480_v54 = vpop.permute.xlu1 %556 }
 0x1ae   :  { %2736 = vmatpush3.bf16.msra.mxu0 %v403_v32 }
 0x1af   :  { %2732 = vmatmul.mubr.msk.bf16.vlgmr.msra.gmra.mxu1 %vm284_vm3, %v3435_v31  ;;  %v449_v35 = vpop.permute.xlu0 %448  ;;  %2747 = vmatprep.subr.bf16.mxu0 %v3276_v0 }
 0x1b0   :  { %v454_v36 = vsel %vm288_vm2, %v449_v35, 0  ;;  %2743 = vmatprep.mubr.msk.bf16.mxu1 %vm3278_vm0, %v3276_v0 }
 0x1b1   :  { %2738 = vmatmul.mubr.msk.bf16.vlgmr.msra.gmra.mxu0 %vm284_vm3, %v3439_v33  ;;  %2742 = vmatpush3.bf16.msra.mxu1 %v454_v36 }
 0x1b2   :  { %2748 = vmatpush3.bf16.msra.mxu0 %v3441_v34  ;;  %2751 = vmatprep.mubr.msk.bf16.mxu0 %vm3278_vm0, %v3276_v0 }
 0x1b3   :  { %2749 = vmatprep.subr.bf16.mxu0 %v3276_v0  ;;  %602 = vmatprep.subr.bf16.mxu1 %v3383_v2 }
 0x1b6   :  { %2750 = vmatpush3.bf16.msra.mxu0 %v3452_v37 }
 0x1b7   :  { %2744 = vmatmul.mubr.msk.bf16.vlgmr.msra.gmra.mxu1 %vm284_vm3, %v3458_v38  ;;  %2755 = vmatprep.subr.bf16.mxu0 %v3276_v0 }
 0x1b8   :  { %603 = vmatpush1.bf16.msra.mxu1 %v3385_v3  ;;  %622 = vmatprep.mubr.bf16.mxu1 %v3277_v1 }
 0x1b9   :  { %2752 = vmatmul.mubr.msk.bf16.vlgmr.msra.gmra.mxu0 %vm195_vm1, %v3404_v9  ;;  %604 = vmatprep.subr.bf16.mxu1 %v3391_v5 }
 0x1ba   :  { %2756 = vmatpush3.bf16.msra.mxu0 %v3388_v4  ;;  %2759 = vmatprep.mubr.msk.bf16.mxu0 %vm3278_vm0, %v3276_v0 }
 0x1bb   :  { %2757 = vmatprep.subr.bf16.mxu0 %v3276_v0 }
 0x1bc   :  { %605 = vmatpush1.bf16.msra.mxu1 %v3393_v6 }
 0x1bd   :  { %2763 = vmatprep.subr.bf16.mxu1 %v3276_v0 }
 0x1be   :  { %2758 = vmatpush3.bf16.msra.mxu0 %v3396_v7 }
 0x1bf   :  { %2769 = vmatprep.subr.bf16.mxu0 %v3276_v0 }
 0x1f7   :  { %v326_v39 = vpop.f32.mrf.mxu0 }
 0x1f8   :  { %v332_v44 = vadd.f32 %v326_v39, %v3477_v43 }
 0x1f9   :  { %v2727_v40 = vpop.f32.mrf.mxu0 }
 0x1fb   :  { %v329_v41 = vpop.f32.mrf.mxu0 }
 0x1fd   :  { %v2728_v42 = vpop.f32.mrf.mxu0 }
 0x26f   :  { %v383_v45 = vpop.f32.mrf.mxu1 }
 0x270   :  { %v389_v46 = vadd.f32 %v383_v45, %v332_v44 }
 0x271   :  { %v2733_v47 = vpop.f32.mrf.mxu1  ;;  %v439_v48 = vpop.f32.mrf.mxu0 }
 0x272   :  { %v445_v49 = vadd.f32 %v439_v48, %v389_v46 }
 0x273   :  { %v386_v50 = vpop.f32.mrf.mxu1  ;;  %v2739_v51 = vpop.f32.mrf.mxu0 }
 0x275   :  { %v2734_v52 = vpop.f32.mrf.mxu1  ;;  %v442_v53 = vpop.f32.mrf.mxu0 }
 0x277   :  { %v2740_v55 = vpop.f32.mrf.mxu0  ;;  %v490_v56 = vpop.f32.mrf.mxu1 }
 0x278   :  { %v496_v57 = vadd.f32 %v490_v56, %v445_v49 }
 0x279   :  { %v543_v58 = vpop.f32.mrf.mxu0  ;;  %v2745_v59 = vpop.f32.mrf.mxu1 }
 0x27a   :  { %v559_v60 = vadd.f32 %v3480_v54, %v543_v58  ;;  %v549_v11 = vadd.f32 %v543_v58, %v496_v57 }
 0x27b   :  { %v2753_v61 = vpop.f32.mrf.mxu0  ;;  %v493_v62 = vpop.f32.mrf.mxu1 }
 0x27c   :  { %561 = vrot.lane.b32.xlu0 %v559_v60, %s3265_s24  ;;  %v2566_v12 = vmul.f32 -1.442695, %v549_v11 }
 0x27d   :  { %v546_v63 = vpop.f32.mrf.mxu0  ;;  %v2746_v9 = vpop.f32.mrf.mxu1 }
 0x27e   :  { %3029 = vpow2.f32 %v2566_v12 }
 0x27f   :  { %v2754_v10 = vpop.f32.mrf.mxu0 }
 0x28b   :  { %v3030_v13 = vpop.eup %3029 }
 0x28c   :  { %v553_v14 = vadd.f32 1.0, %v3030_v13 }
 0x28e   :  { %3031 = vrcp.f32 %v553_v14 }
 0x29b   :  { %v3032_v15 = vpop.eup %3031 }
 0x29c   :  { %v571_v23 = vsub.f32 1.0, %v3032_v15 }
 0x2ee   :  { %v562_v16 = vpop.permute.xlu0 %561 }
 0x2ef   :  { %v564_v17 = vmul.f32 %v3032_v15, %v562_v16 }
 0x2f1   :  { %566 = vrot.lane.b32.xlu1 %v564_v17, %s3265_s24 }
 0x2f5   :  { %578 = vrot.lane.b32.xlu1 %v3398_v8, %s3279_s6 }
 0x363   :  { %v567_v19 = vpop.permute.xlu1 %566 }
 0x364   :  { %v569_v20 = vadd.f32 %v567_v19, %v496_v57 }
 0x366   :  { %3033 = vtanh.f32 %v569_v20 }
 0x367   :  { %v579_v22 = vpop.permute.xlu1 %578 }
 0x368   :  { %v581_v25 = vmul.f32 %v3032_v15, %v579_v22 }
 0x373   :  { %v3034_v21 = vpop.eup %3033 }
 0x374   :  { %573 = vrot.lane.b32.xlu0 %v3034_v21, %s3280_s7 }
 0x3e6   :  { %v574_v24 = vpop.permute.xlu0 %573 }
 0x3e7   :  { %v576_v26 = vmul.f32 %v574_v24, %v571_v23 }
 0x3e9   :  { %v3488_v27 = vadd.f32 %v581_v25, %v576_v26 }
 0x3eb   :  { %v583_v28 = vpack.c.bf16 %v3488_v27, %v3488_v27 }
 0x3ed   :  { %585 = vrot.lane.b32.xlu0 %v583_v28, %s3280_s7 }
 0x45f   :  { %v586_v29 = vpop.permute.xlu0 %585 }
 0x460   :  { %2567 = vmatmul.mubr.msk.bf16.vlgmr.msra.gmra.mxu1 %vm195_vm1, %v586_v29  ;;  %2760 = vmatmul.mubr.msk.bf16.vlgmr.msra.gmra.mxu0 %vm195_vm1, %v586_v29 }
 0x461   :  { %2765 = vmatprep.mubr.msk.bf16.mxu1 %vm3278_vm0, %v3276_v0  ;;  %2771 = vmatprep.mubr.msk.bf16.mxu0 %vm3278_vm0, %v3276_v0 }
 0x520   :  { %v624_v8 = vpop.f32.mrf.mxu1  ;;  %v665_v30 = vpop.f32.mrf.mxu0 }
 0x521   :  { %v671_v32 = vpack.c.bf16 %v624_v8, %v624_v8  ;;  %v673_v35 = vpack.c.bf16 %v665_v30, %v665_v30 }
 0x522   :  { %v626_v36 = vpop.f32.mrf.mxu1  ;;  %v2761_v39 = vpop.f32.mrf.mxu0 }
 0x523   :  { %v675_v40 = vsel %vm288_vm2, %v671_v32, 0  ;;  %v672_v41 = vpack.c.bf16 %v626_v36, %v626_v36  ;;  %772 = vrot.lane.b32.xlu0 %v673_v35, %s3265_s24 }
 0x524   :  { %v628_v42 = vpop.f32.mrf.mxu1  ;;  %v668_v44 = vpop.f32.mrf.mxu0  ;;  %2764 = vmatpush3.bf16.msra.mxu1 %v675_v40 }
 0x525   :  { %770 = vrot.lane.b32.xlu1 %v672_v41, %s3265_s24  ;;  %2775 = vmatprep.subr.bf16.mxu1 %v3276_v0 }
 0x526   :  { %v629_v45 = vpop.f32.mrf.mxu1  ;;  %v2762_v46 = vpop.f32.mrf.mxu0 }
 0x527   :  { %722 = vrot.lane.b32.xlu0 %v672_v41, %s3279_s6  ;;  %2766 = vmatmul.mubr.msk.bf16.vlgmr.msra.gmra.mxu1 %vm284_vm3, %v3420_v18 }
 0x528   :  { %2777 = vmatprep.mubr.msk.bf16.mxu1 %vm3278_vm0, %v3276_v0 }
 0x529   :  { %720 = vrot.lane.b32.xlu1 %v671_v32, %s3279_s6 }
 0x52d   :  { %819 = vrot.lane.b32.xlu1 %v673_v35, %s3280_s7 }
 0x595   :  { %v773_v47 = vpop.permute.xlu0 %772 }
 0x597   :  { %v771_v48 = vpop.permute.xlu1 %770 }
 0x598   :  { %v774_v49 = vsel %vm397_vm4, %v771_v48, %v773_v47 }
 0x599   :  { %v776_v50 = vsel %vm288_vm2, %v774_v49, 0  ;;  %v723_v51 = vpop.permute.xlu0 %722 }
 0x59a   :  { %2776 = vmatpush3.bf16.msra.mxu1 %v776_v50 }
 0x59b   :  { %v721_v52 = vpop.permute.xlu1 %720  ;;  %2787 = vmatprep.subr.bf16.mxu1 %v3276_v0 }
 0x59c   :  { %v724_v53 = vsel %vm195_vm1, %v721_v52, %v723_v51 }
 0x59d   :  { %v726_v55 = vsel %vm288_vm2, %v724_v53, 0  ;;  %2778 = vmatmul.mubr.msk.bf16.vlgmr.msra.gmra.mxu1 %vm284_vm3, %v3439_v33 }
 0x59e   :  { %2770 = vmatpush3.bf16.msra.mxu0 %v726_v55  ;;  %2788 = vmatpush3.bf16.msra.mxu1 %v3441_v34 }
 0x59f   :  { %v820_v56 = vpop.permute.xlu1 %819  ;;  %2781 = vmatprep.subr.bf16.mxu0 %v3276_v0  ;;  %2789 = vmatprep.subr.bf16.mxu1 %v3276_v0 }
 0x5a0   :  { %v822_v57 = vsel %vm288_vm2, %v820_v56, 0  ;;  %2791 = vmatprep.mubr.msk.bf16.mxu1 %vm3278_vm0, %v3276_v0 }
 0x5a1   :  { %2772 = vmatmul.mubr.msk.bf16.vlgmr.msra.gmra.mxu0 %vm284_vm3, %v3435_v31 }
 0x5a2   :  { %2782 = vmatpush3.bf16.msra.mxu0 %v822_v57  ;;  %2790 = vmatpush3.bf16.msra.mxu1 %v3452_v37 }
 0x5a3   :  { %2783 = vmatprep.mubr.msk.bf16.mxu0 %vm3278_vm0, %v3276_v0  ;;  %951 = vmatprep.subr.bf16.mxu0 %v3383_v2 }
 0x5a4   :  { %2795 = vmatprep.subr.bf16.mxu1 %v3276_v0 }
 0x5a5   :  { %2792 = vmatmul.mubr.msk.bf16.vlgmr.msra.gmra.mxu1 %vm195_vm1, %v586_v29 }
 0x5a6   :  { %2796 = vmatpush3.bf16.msra.mxu1 %v3388_v4  ;;  %2799 = vmatprep.mubr.msk.bf16.mxu1 %vm3278_vm0, %v3276_v0 }
 0x5a7   :  { %2797 = vmatprep.subr.bf16.mxu1 %v3276_v0 }
 0x5a9   :  { %2784 = vmatmul.mubr.msk.bf16.vlgmr.msra.gmra.mxu0 %vm284_vm3, %v3458_v38 }
 0x5aa   :  { %952 = vmatpush1.bf16.msra.mxu0 %v3385_v3  ;;  %2798 = vmatpush3.bf16.msra.mxu1 %v3396_v7 }
 0x5ab   :  { %953 = vmatprep.subr.bf16.mxu0 %v3391_v5  ;;  %971 = vmatprep.mubr.bf16.mxu0 %v3277_v1 }
 0x5ac   :  { %2809 = vmatprep.subr.bf16.mxu1 %v3276_v0 }
 0x5ae   :  { %954 = vmatpush1.bf16.msra.mxu0 %v3393_v6 }
 0x5af   :  { %2803 = vmatprep.subr.bf16.mxu0 %v3276_v0 }
 0x5e7   :  { %v711_v58 = vpop.f32.mrf.mxu1 }
 0x5e8   :  { %v717_v9 = vadd.f32 %v711_v58, %v3477_v43 }
 0x5e9   :  { %v2767_v59 = vpop.f32.mrf.mxu1 }
 0x5eb   :  { %v714_v60 = vpop.f32.mrf.mxu1 }
 0x5ed   :  { %v2768_v61 = vpop.f32.mrf.mxu1 }
 0x65d   :  { %v812_v62 = vpop.f32.mrf.mxu1 }
 0x65f   :  { %v2779_v63 = vpop.f32.mrf.mxu1 }
 0x661   :  { %v762_v10 = vpop.f32.mrf.mxu0  ;;  %v815_v11 = vpop.f32.mrf.mxu1 }
 0x662   :  { %v768_v12 = vadd.f32 %v762_v10, %v717_v9 }
 0x663   :  { %v2773_v13 = vpop.f32.mrf.mxu0  ;;  %v2780_v14 = vpop.f32.mrf.mxu1 }
 0x664   :  { %v818_v15 = vadd.f32 %v812_v62, %v768_v12 }
 0x665   :  { %v765_v16 = vpop.f32.mrf.mxu0  ;;  %v899_v17 = vpop.f32.mrf.mxu1 }
 0x666   :  { %v912_v19 = vadd.f32 %v899_v17, %v3480_v54 }
 0x667   :  { %v2774_v20 = vpop.f32.mrf.mxu0  ;;  %v2793_v21 = vpop.f32.mrf.mxu1 }
 0x668   :  { %914 = vrot.lane.b32.xlu0 %v912_v19, %s3265_s24 }
 0x669   :  { %v858_v22 = vpop.f32.mrf.mxu0  ;;  %v902_v23 = vpop.f32.mrf.mxu1 }
 0x66a   :  { %v864_v24 = vadd.f32 %v858_v22, %v818_v15 }
 0x66b   :  { %v2794_v25 = vpop.f32.mrf.mxu1  ;;  %v2785_v26 = vpop.f32.mrf.mxu0 }
 0x66c   :  { %v905_v8 = vadd.f32 %v899_v17, %v864_v24 }
 0x66d   :  { %v861_v28 = vpop.f32.mrf.mxu0 }
 0x66e   :  { %v2574_v30 = vmul.f32 -1.442695, %v905_v8 }
 0x66f   :  { %v2786_v29 = vpop.f32.mrf.mxu0 }
 0x670   :  { %3035 = vpow2.f32 %v2574_v30 }
 0x67d   :  { %v3036_v32 = vpop.eup %3035 }
 0x67e   :  { %v909_v35 = vadd.f32 1.0, %v3036_v32 }
 0x680   :  { %3037 = vrcp.f32 %v909_v35 }
 0x68d   :  { %v3038_v36 = vpop.eup %3037 }
 0x68e   :  { %v924_v45 = vsub.f32 1.0, %v3038_v36  ;;  %v930_v47 = vmul.f32 %v3038_v36, %v3488_v27 }
 0x6da   :  { %v915_v39 = vpop.permute.xlu0 %914 }
 0x6db   :  { %v917_v40 = vmul.f32 %v3038_v36, %v915_v39 }
 0x6dd   :  { %919 = vrot.lane.b32.xlu1 %v917_v40, %s3265_s24 }
 0x74f   :  { %v920_v41 = vpop.permute.xlu1 %919 }
 0x750   :  { %v922_v42 = vadd.f32 %v920_v41, %v864_v24 }
 0x752   :  { %3039 = vtanh.f32 %v922_v42 }
 0x75f   :  { %v3040_v44 = vpop.eup %3039 }
 0x760   :  { %926 = vrot.lane.b32.xlu0 %v3040_v44, %s3280_s7 }
 0x7d2   :  { %v927_v46 = vpop.permute.xlu0 %926 }
 0x7d3   :  { %v929_v48 = vmul.f32 %v927_v46, %v924_v45 }
 0x7d5   :  { %v3550_v49 = vadd.f32 %v930_v47, %v929_v48 }
 0x7d7   :  { %v932_v50 = vpack.c.bf16 %v3550_v49, %v3550_v49 }
 0x7d9   :  { %934 = vrot.lane.b32.xlu1 %v932_v50, %s3280_s7 }
 0x84b   :  { %v935_v51 = vpop.permute.xlu1 %934 }
 0x84c   :  { %2575 = vmatmul.mubr.msk.bf16.vlgmr.msra.gmra.mxu0 %vm195_vm1, %v935_v51  ;;  %2800 = vmatmul.mubr.msk.bf16.vlgmr.msra.gmra.mxu1 %vm195_vm1, %v935_v51 }
 0x84d   :  { %2805 = vmatprep.mubr.msk.bf16.mxu0 %vm3278_vm0, %v3276_v0  ;;  %2811 = vmatprep.mubr.msk.bf16.mxu1 %vm3278_vm0, %v3276_v0 }
 0x90c   :  { %v973_v27 = vpop.f32.mrf.mxu0  ;;  %v1014_v52 = vpop.f32.mrf.mxu1 }
 0x90d   :  { %v1020_v53 = vpack.c.bf16 %v973_v27, %v973_v27  ;;  %v1022_v55 = vpack.c.bf16 %v1014_v52, %v1014_v52 }
 0x90e   :  { %v975_v56 = vpop.f32.mrf.mxu0  ;;  %v2801_v57 = vpop.f32.mrf.mxu1 }
 0x90f   :  { %v1024_v58 = vsel %vm288_vm2, %v1020_v53, 0  ;;  %v1021_v59 = vpack.c.bf16 %v975_v56, %v975_v56  ;;  %1121 = vrot.lane.b32.xlu1 %v1022_v55, %s3265_s24 }
 0x910   :  { %v977_v60 = vpop.f32.mrf.mxu0  ;;  %v1017_v61 = vpop.f32.mrf.mxu1  ;;  %2804 = vmatpush3.bf16.msra.mxu0 %v1024_v58 }
 0x911   :  { %1119 = vrot.lane.b32.xlu0 %v1021_v59, %s3265_s24  ;;  %2815 = vmatprep.subr.bf16.mxu0 %v3276_v0 }
 0x912   :  { %v978_v62 = vpop.f32.mrf.mxu0  ;;  %v2802_v63 = vpop.f32.mrf.mxu1 }
 0x913   :  { %1071 = vrot.lane.b32.xlu1 %v1021_v59, %s3279_s6  ;;  %2806 = vmatmul.mubr.msk.bf16.vlgmr.msra.gmra.mxu0 %vm284_vm3, %v3420_v18 }
 0x914   :  { %2817 = vmatprep.mubr.msk.bf16.mxu0 %vm3278_vm0, %v3276_v0 }
 0x915   :  { %1069 = vrot.lane.b32.xlu0 %v1020_v53, %s3279_s6 }
 0x919   :  { %1168 = vrot.lane.b32.xlu0 %v1022_v55, %s3280_s7 }
 0x981   :  { %v1122_v9 = vpop.permute.xlu1 %1121 }
 0x983   :  { %v1120_v10 = vpop.permute.xlu0 %1119 }
 0x984   :  { %v1123_v11 = vsel %vm397_vm4, %v1120_v10, %v1122_v9 }
 0x985   :  { %v1125_v12 = vsel %vm288_vm2, %v1123_v11, 0  ;;  %v1072_v13 = vpop.permute.xlu1 %1071 }
 0x986   :  { %2816 = vmatpush3.bf16.msra.mxu0 %v1125_v12 }
 0x987   :  { %v1070_v14 = vpop.permute.xlu0 %1069  ;;  %2827 = vmatprep.subr.bf16.mxu0 %v3276_v0 }
 0x988   :  { %v1073_v15 = vsel %vm195_vm1, %v1070_v14, %v1072_v13 }
 0x989   :  { %v1075_v16 = vsel %vm288_vm2, %v1073_v15, 0  ;;  %2818 = vmatmul.mubr.msk.bf16.vlgmr.msra.gmra.mxu0 %vm284_vm3, %v3439_v33 }
 0x98a   :  { %2810 = vmatpush3.bf16.msra.mxu1 %v1075_v16  ;;  %2828 = vmatpush3.bf16.msra.mxu0 %v3441_v34 }
 0x98b   :  { %v1169_v17 = vpop.permute.xlu0 %1168  ;;  %2821 = vmatprep.subr.bf16.mxu1 %v3276_v0  ;;  %2829 = vmatprep.subr.bf16.mxu0 %v3276_v0 }
 0x98c   :  { %v1171_v19 = vsel %vm288_vm2, %v1169_v17, 0  ;;  %2831 = vmatprep.mubr.msk.bf16.mxu0 %vm3278_vm0, %v3276_v0 }
 0x98d   :  { %2812 = vmatmul.mubr.msk.bf16.vlgmr.msra.gmra.mxu1 %vm284_vm3, %v3435_v31 }
 0x98e   :  { %2822 = vmatpush3.bf16.msra.mxu1 %v1171_v19  ;;  %2830 = vmatpush3.bf16.msra.mxu0 %v3452_v37 }
 0x98f   :  { %2823 = vmatprep.mubr.msk.bf16.mxu1 %vm3278_vm0, %v3276_v0  ;;  %1300 = vmatprep.subr.bf16.mxu1 %v3383_v2 }
 0x990   :  { %2835 = vmatprep.subr.bf16.mxu0 %v3276_v0 }
 0x991   :  { %2832 = vmatmul.mubr.msk.bf16.vlgmr.msra.gmra.mxu0 %vm195_vm1, %v935_v51 }
 0x992   :  { %2836 = vmatpush3.bf16.msra.mxu0 %v3388_v4  ;;  %2839 = vmatprep.mubr.msk.bf16.mxu0 %vm3278_vm0, %v3276_v0 }
 0x993   :  { %2837 = vmatprep.subr.bf16.mxu0 %v3276_v0 }
 0x995   :  { %2824 = vmatmul.mubr.msk.bf16.vlgmr.msra.gmra.mxu1 %vm284_vm3, %v3458_v38 }
 0x996   :  { %1301 = vmatpush1.bf16.msra.mxu1 %v3385_v3  ;;  %2838 = vmatpush3.bf16.msra.mxu0 %v3396_v7 }
 0x997   :  { %1302 = vmatprep.subr.bf16.mxu1 %v3391_v5  ;;  %1320 = vmatprep.mubr.bf16.mxu1 %v3277_v1 }
 0x998   :  { %2849 = vmatprep.subr.bf16.mxu0 %v3276_v0 }
 0x99a   :  { %1303 = vmatpush1.bf16.msra.mxu1 %v3393_v6 }
 0x99b   :  { %2843 = vmatprep.subr.bf16.mxu1 %v3276_v0 }
 0x9d3   :  { %v1060_v20 = vpop.f32.mrf.mxu0 }
 0x9d4   :  { %v1066_v26 = vadd.f32 %v1060_v20, %v3477_v43 }
 0x9d5   :  { %v2807_v21 = vpop.f32.mrf.mxu0 }
 0x9d7   :  { %v1063_v22 = vpop.f32.mrf.mxu0 }
 0x9d9   :  { %v2808_v23 = vpop.f32.mrf.mxu0 }
 0xa49   :  { %v1161_v24 = vpop.f32.mrf.mxu0 }
 0xa4b   :  { %v2819_v25 = vpop.f32.mrf.mxu0 }
 0xa4d   :  { %v1111_v28 = vpop.f32.mrf.mxu1  ;;  %v1164_v29 = vpop.f32.mrf.mxu0 }
 0xa4e   :  { %v1117_v8 = vadd.f32 %v1111_v28, %v1066_v26 }
 0xa4f   :  { %v2813_v30 = vpop.f32.mrf.mxu1  ;;  %v2820_v32 = vpop.f32.mrf.mxu0 }
 0xa50   :  { %v1167_v35 = vadd.f32 %v1161_v24, %v1117_v8 }
 0xa51   :  { %v1114_v36 = vpop.f32.mrf.mxu1  ;;  %v1248_v39 = vpop.f32.mrf.mxu0 }
 0xa52   :  { %v1261_v40 = vadd.f32 %v1248_v39, %v3480_v54 }
 0xa53   :  { %v2814_v41 = vpop.f32.mrf.mxu1  ;;  %v2833_v42 = vpop.f32.mrf.mxu0 }
 0xa54   :  { %1263 = vrot.lane.b32.xlu1 %v1261_v40, %s3265_s24 }
 0xa55   :  { %v1207_v44 = vpop.f32.mrf.mxu1  ;;  %v1251_v45 = vpop.f32.mrf.mxu0 }
 0xa56   :  { %v1213_v46 = vadd.f32 %v1207_v44, %v1167_v35 }
 0xa57   :  { %v2834_v47 = vpop.f32.mrf.mxu0  ;;  %v2825_v48 = vpop.f32.mrf.mxu1 }
 0xa58   :  { %v1254_v27 = vadd.f32 %v1248_v39, %v1213_v46 }
 0xa59   :  { %v1210_v50 = vpop.f32.mrf.mxu1 }
 0xa5a   :  { %v2582_v52 = vmul.f32 -1.442695, %v1254_v27 }
 0xa5b   :  { %v2826_v51 = vpop.f32.mrf.mxu1 }
 0xa5c   :  { %3041 = vpow2.f32 %v2582_v52 }
 0xa69   :  { %v3042_v53 = vpop.eup %3041 }
 0xa6a   :  { %v1258_v55 = vadd.f32 1.0, %v3042_v53 }
 0xa6c   :  { %3043 = vrcp.f32 %v1258_v55 }
 0xa79   :  { %v3044_v56 = vpop.eup %3043 }
 0xa7a   :  { %v1273_v62 = vsub.f32 1.0, %v3044_v56  ;;  %v1279_v9 = vmul.f32 %v3044_v56, %v3550_v49 }
 0xac6   :  { %v1264_v57 = vpop.permute.xlu1 %1263 }
 0xac7   :  { %v1266_v58 = vmul.f32 %v3044_v56, %v1264_v57 }
 0xac9   :  { %1268 = vrot.lane.b32.xlu0 %v1266_v58, %s3265_s24 }
 0xb3b   :  { %v1269_v59 = vpop.permute.xlu0 %1268 }
 0xb3c   :  { %v1271_v60 = vadd.f32 %v1269_v59, %v1213_v46 }
 0xb3e   :  { %3045 = vtanh.f32 %v1271_v60 }
 0xb4b   :  { %v3046_v61 = vpop.eup %3045 }
 0xb4c   :  { %1275 = vrot.lane.b32.xlu1 %v3046_v61, %s3280_s7 }
 0xbbe   :  { %v1276_v63 = vpop.permute.xlu1 %1275 }
 0xbbf   :  { %v1278_v10 = vmul.f32 %v1276_v63, %v1273_v62 }
 0xbc1   :  { %v3612_v11 = vadd.f32 %v1279_v9, %v1278_v10 }
 0xbc3   :  { %v1281_v12 = vpack.c.bf16 %v3612_v11, %v3612_v11 }
 0xbc5   :  { %1283 = vrot.lane.b32.xlu0 %v1281_v12, %s3280_s7 }
 0xc37   :  { %v1284_v13 = vpop.permute.xlu0 %1283 }
 0xc38   :  { %2583 = vmatmul.mubr.msk.bf16.vlgmr.msra.gmra.mxu1 %vm195_vm1, %v1284_v13  ;;  %2840 = vmatmul.mubr.msk.bf16.vlgmr.msra.gmra.mxu0 %vm195_vm1, %v1284_v13 }
 0xc39   :  { %2845 = vmatprep.mubr.msk.bf16.mxu1 %vm3278_vm0, %v3276_v0  ;;  %2851 = vmatprep.mubr.msk.bf16.mxu0 %vm3278_vm0, %v3276_v0 }
 0xcf8   :  { %v1322_v49 = vpop.f32.mrf.mxu1  ;;  %v1363_v14 = vpop.f32.mrf.mxu0 }
 0xcf9   :  { %v1369_v15 = vpack.c.bf16 %v1322_v49, %v1322_v49  ;;  %v1371_v16 = vpack.c.bf16 %v1363_v14, %v1363_v14 }
 0xcfa   :  { %v1324_v17 = vpop.f32.mrf.mxu1  ;;  %v2841_v19 = vpop.f32.mrf.mxu0 }
 0xcfb   :  { %v1373_v20 = vsel %vm288_vm2, %v1369_v15, 0  ;;  %v1370_v21 = vpack.c.bf16 %v1324_v17, %v1324_v17  ;;  %1470 = vrot.lane.b32.xlu0 %v1371_v16, %s3265_s24 }
 0xcfc   :  { %v1326_v22 = vpop.f32.mrf.mxu1  ;;  %v1366_v23 = vpop.f32.mrf.mxu0  ;;  %2844 = vmatpush3.bf16.msra.mxu1 %v1373_v20 }
 0xcfd   :  { %1468 = vrot.lane.b32.xlu1 %v1370_v21, %s3265_s24  ;;  %2855 = vmatprep.subr.bf16.mxu1 %v3276_v0 }
 0xcfe   :  { %v1327_v24 = vpop.f32.mrf.mxu1  ;;  %v2842_v25 = vpop.f32.mrf.mxu0 }
 0xcff   :  { %1420 = vrot.lane.b32.xlu0 %v1370_v21, %s3279_s6  ;;  %2846 = vmatmul.mubr.msk.bf16.vlgmr.msra.gmra.mxu1 %vm284_vm3, %v3420_v18 }
 0xd00   :  { %2857 = vmatprep.mubr.msk.bf16.mxu1 %vm3278_vm0, %v3276_v0 }
 0xd01   :  { %1418 = vrot.lane.b32.xlu1 %v1369_v15, %s3279_s6 }
 0xd05   :  { %1517 = vrot.lane.b32.xlu1 %v1371_v16, %s3280_s7 }
 0xd6d   :  { %v1471_v26 = vpop.permute.xlu0 %1470 }
 0xd6f   :  { %v1469_v28 = vpop.permute.xlu1 %1468 }
 0xd70   :  { %v1472_v29 = vsel %vm397_vm4, %v1469_v28, %v1471_v26 }
 0xd71   :  { %v1474_v8 = vsel %vm288_vm2, %v1472_v29, 0  ;;  %v1421_v30 = vpop.permute.xlu0 %1420 }
 0xd72   :  { %2856 = vmatpush3.bf16.msra.mxu1 %v1474_v8 }
 0xd73   :  { %v1419_v32 = vpop.permute.xlu1 %1418  ;;  %2867 = vmatprep.subr.bf16.mxu1 %v3276_v0 }
 0xd74   :  { %v1422_v35 = vsel %vm195_vm1, %v1419_v32, %v1421_v30 }
 0xd75   :  { %v1424_v36 = vsel %vm288_vm2, %v1422_v35, 0  ;;  %2858 = vmatmul.mubr.msk.bf16.vlgmr.msra.gmra.mxu1 %vm284_vm3, %v3439_v33 }
 0xd76   :  { %2850 = vmatpush3.bf16.msra.mxu0 %v1424_v36  ;;  %2868 = vmatpush3.bf16.msra.mxu1 %v3441_v34 }
 0xd77   :  { %v1518_v39 = vpop.permute.xlu1 %1517  ;;  %2861 = vmatprep.subr.bf16.mxu0 %v3276_v0  ;;  %2869 = vmatprep.subr.bf16.mxu1 %v3276_v0 }
 0xd78   :  { %v1520_v40 = vsel %vm288_vm2, %v1518_v39, 0  ;;  %2871 = vmatprep.mubr.msk.bf16.mxu1 %vm3278_vm0, %v3276_v0 }
 0xd79   :  { %2852 = vmatmul.mubr.msk.bf16.vlgmr.msra.gmra.mxu0 %vm284_vm3, %v3435_v31 }
 0xd7a   :  { %2862 = vmatpush3.bf16.msra.mxu0 %v1520_v40  ;;  %2870 = vmatpush3.bf16.msra.mxu1 %v3452_v37 }
 0xd7b   :  { %2863 = vmatprep.mubr.msk.bf16.mxu0 %vm3278_vm0, %v3276_v0  ;;  %1649 = vmatprep.subr.bf16.mxu0 %v3383_v2 }
 0xd7c   :  { %2875 = vmatprep.subr.bf16.mxu1 %v3276_v0 }
 0xd7d   :  { %2872 = vmatmul.mubr.msk.bf16.vlgmr.msra.gmra.mxu1 %vm195_vm1, %v1284_v13 }
 0xd7e   :  { %2876 = vmatpush3.bf16.msra.mxu1 %v3388_v4  ;;  %2879 = vmatprep.mubr.msk.bf16.mxu1 %vm3278_vm0, %v3276_v0 }
 0xd7f   :  { %2877 = vmatprep.subr.bf16.mxu1 %v3276_v0 }
 0xd81   :  { %2864 = vmatmul.mubr.msk.bf16.vlgmr.msra.gmra.mxu0 %vm284_vm3, %v3458_v38 }
 0xd82   :  { %1650 = vmatpush1.bf16.msra.mxu0 %v3385_v3  ;;  %2878 = vmatpush3.bf16.msra.mxu1 %v3396_v7 }
 0xd83   :  { %1651 = vmatprep.subr.bf16.mxu0 %v3391_v5  ;;  %1669 = vmatprep.mubr.bf16.mxu0 %v3277_v1 }
 0xd84   :  { %2889 = vmatprep.subr.bf16.mxu1 %v3276_v0 }
 0xd86   :  { %1652 = vmatpush1.bf16.msra.mxu0 %v3393_v6 }
 0xd87   :  { %2883 = vmatprep.subr.bf16.mxu0 %v3276_v0 }
 0xdbf   :  { %v1409_v2 = vpop.f32.mrf.mxu1 }
 0xdc0   :  { %v1415_v3 = vadd.f32 %v1409_v2, %v3477_v43 }
 0xdc1   :  { %v2847_v4 = vpop.f32.mrf.mxu1 }
 0xdc3   :  { %v1412_v41 = vpop.f32.mrf.mxu1 }
 0xdc5   :  { %v2848_v42 = vpop.f32.mrf.mxu1 }
 0xe35   :  { %v1510_v44 = vpop.f32.mrf.mxu1 }
 0xe37   :  { %v2859_v45 = vpop.f32.mrf.mxu1 }
 0xe39   :  { %v1460_v46 = vpop.f32.mrf.mxu0  ;;  %v1513_v7 = vpop.f32.mrf.mxu1 }
 0xe3a   :  { %v1466_v47 = vadd.f32 %v1460_v46, %v1415_v3 }
 0xe3b   :  { %v2853_v5 = vpop.f32.mrf.mxu0  ;;  %v2860_v48 = vpop.f32.mrf.mxu1 }
 0xe3c   :  { %v1516_v1 = vadd.f32 %v1510_v44, %v1466_v47 }
 0xe3d   :  { %v1463_v50 = vpop.f32.mrf.mxu0  ;;  %v1597_v51 = vpop.f32.mrf.mxu1 }
 0xe3e   :  { %v1610_v6 = vadd.f32 %v1597_v51, %v3480_v54 }
 0xe3f   :  { %v2854_v27 = vpop.f32.mrf.mxu0  ;;  %v2873_v52 = vpop.f32.mrf.mxu1 }
 0xe40   :  { %1612 = vrot.lane.b32.xlu0 %v1610_v6, %s3265_s24 }
 0xe41   :  { %v1556_v53 = vpop.f32.mrf.mxu0  ;;  %v1600_v55 = vpop.f32.mrf.mxu1 }
 0xe42   :  { %v1562_v56 = vadd.f32 %v1556_v53, %v1516_v1 }
 0xe43   :  { %v2874_v57 = vpop.f32.mrf.mxu1  ;;  %v2865_v58 = vpop.f32.mrf.mxu0 }
 0xe44   :  { %v1603_v61 = vadd.f32 %v1597_v51, %v1562_v56 }
 0xe45   :  { %v1559_v59 = vpop.f32.mrf.mxu0 }
 0xe46   :  { %v2590_v62 = vmul.f32 -1.442695, %v1603_v61 }
 0xe47   :  { %v2866_v60 = vpop.f32.mrf.mxu0 }
 0xe48   :  { %3047 = vpow2.f32 %v2590_v62 }
 0xe55   :  { %v3048_v63 = vpop.eup %3047 }
 0xe56   :  { %v1607_v9 = vadd.f32 1.0, %v3048_v63 }
 0xe58   :  { %3049 = vrcp.f32 %v1607_v9 }
 0xe65   :  { %v3050_v10 = vpop.eup %3049 }
 0xe66   :  { %v1622_v16 = vsub.f32 1.0, %v3050_v10  ;;  %v1628_v19 = vmul.f32 %v3050_v10, %v3612_v11 }
 0xeb2   :  { %v1613_v12 = vpop.permute.xlu0 %1612 }
 0xeb3   :  { %v1615_v13 = vmul.f32 %v3050_v10, %v1613_v12 }
 0xeb5   :  { %1617 = vrot.lane.b32.xlu1 %v1615_v13, %s3265_s24 }
 0xf27   :  { %v1618_v49 = vpop.permute.xlu1 %1617 }
 0xf28   :  { %v1620_v14 = vadd.f32 %v1618_v49, %v1562_v56 }
 0xf2a   :  { %3051 = vtanh.f32 %v1620_v14 }
 0xf37   :  { %v3052_v15 = vpop.eup %3051 }
 0xf38   :  { %1624 = vrot.lane.b32.xlu0 %v3052_v15, %s3280_s7 }
 0xfaa   :  { %v1625_v17 = vpop.permute.xlu0 %1624 }
 0xfab   :  { %v1627_v20 = vmul.f32 %v1625_v17, %v1622_v16 }
 0xfad   :  { %v3674_v21 = vadd.f32 %v1628_v19, %v1627_v20 }
 0xfaf   :  { %v1630_v22 = vpack.c.bf16 %v3674_v21, %v3674_v21 }
 0xfb1   :  { %1632 = vrot.lane.b32.xlu1 %v1630_v22, %s3280_s7  ;;  %v3071_v22 = vld [vmem:[#allocation11] ss:$0 sm:$0xff] }
0x1023   :  { %v1633_v23 = vpop.permute.xlu1 %1632 }
0x1024   :  { %2591 = vmatmul.mubr.msk.bf16.vlgmr.msra.gmra.mxu0 %vm195_vm1, %v1633_v23  ;;  %2880 = vmatmul.mubr.msk.bf16.vlgmr.msra.gmra.mxu1 %vm195_vm1, %v1633_v23 }
0x1025   :  { %2885 = vmatprep.mubr.msk.bf16.mxu0 %vm3278_vm0, %v3276_v0  ;;  %2891 = vmatprep.mubr.msk.bf16.mxu1 %vm3278_vm0, %v3276_v0 }
0x10e4   :  { %v1671_v11 = vpop.f32.mrf.mxu0  ;;  %v1712_v24 = vpop.f32.mrf.mxu1 }
0x10e5   :  { %v1718_v25 = vpack.c.bf16 %v1671_v11, %v1671_v11  ;;  %v1720_v26 = vpack.c.bf16 %v1712_v24, %v1712_v24 }
0x10e6   :  { %v1673_v28 = vpop.f32.mrf.mxu0  ;;  %v2881_v29 = vpop.f32.mrf.mxu1 }
0x10e7   :  { %v1722_v8 = vsel %vm288_vm2, %v1718_v25, 0  ;;  %v1719_v30 = vpack.c.bf16 %v1673_v28, %v1673_v28  ;;  %1819 = vrot.lane.b32.xlu1 %v1720_v26, %s3265_s24 }
0x10e8   :  { %v1675_v32 = vpop.f32.mrf.mxu0  ;;  %v1715_v35 = vpop.f32.mrf.mxu1  ;;  %2884 = vmatpush3.bf16.msra.mxu0 %v1722_v8 }
0x10e9   :  { %1817 = vrot.lane.b32.xlu0 %v1719_v30, %s3265_s24  ;;  %2895 = vmatprep.subr.bf16.mxu0 %v3276_v0  ;;  %v1981_v32 = vld [vmem:[#allocation13] sm:$0x1] }
0x10ea   :  { %v1676_v36 = vpop.f32.mrf.mxu0  ;;  %v2882_v39 = vpop.f32.mrf.mxu1  ;;  %v3015_v35 = vld [vmem:[#allocation8 + $0x44] ss:$24 sps:$4 sm:$0xff]  }
0x10eb   :  { %1769 = vrot.lane.b32.xlu1 %v1719_v30, %s3279_s6  ;;  %2886 = vmatmul.mubr.msk.bf16.vlgmr.msra.gmra.mxu0 %vm284_vm3, %v3420_v18  ;;  %v3016_v36 = vld [vmem:[#allocation8 + $0x14] ss:$24 sps:$4 sm:$0xff]  }
0x10ec   :  { %2897 = vmatprep.mubr.msk.bf16.mxu0 %vm3278_vm0, %v3276_v0 }
0x10ed   :  { %1767 = vrot.lane.b32.xlu0 %v1718_v25, %s3279_s6 }
0x10f1   :  { %1866 = vrot.lane.b32.xlu0 %v1720_v26, %s3280_s7 }
0x1159   :  { %v1820_v40 = vpop.permute.xlu1 %1819 }
0x115b   :  { %v1818_v2 = vpop.permute.xlu0 %1817 }
0x115c   :  { %v1821_v4 = vsel %vm397_vm4, %v1818_v2, %v1820_v40 }
0x115d   :  { %v1823_v41 = vsel %vm288_vm2, %v1821_v4, 0  ;;  %v1770_v42 = vpop.permute.xlu1 %1769 }
0x115e   :  { %2896 = vmatpush3.bf16.msra.mxu0 %v1823_v41  ;;  %v3017_v41 = vld [vmem:[#allocation8 + $0x40] ss:$24 sps:$4 sm:$0xff]  }
0x115f   :  { %v1768_v44 = vpop.permute.xlu0 %1767  ;;  %2907 = vmatprep.subr.bf16.mxu0 %v3276_v0 }
0x1160   :  { %v1771_v18 = vsel %vm195_vm1, %v1768_v44, %v1770_v42  ;;  %v3018_v42 = vld [vmem:[#allocation8 + $0x10] ss:$24 sps:$4 sm:$0xff]   ;;  %v3019_v44 = vld [vmem:[#allocation8 + $0x44] ss:$24 sps:$4 sm:$0xff]  }
0x1161   :  { %v1773_v45 = vsel %vm288_vm2, %v1771_v18, 0  ;;  %2898 = vmatmul.mubr.msk.bf16.vlgmr.msra.gmra.mxu0 %vm284_vm3, %v3439_v33  ;;  %v3021_v18 = vld [vmem:[#allocation8 + $0x40] ss:$24 sps:$4 sm:$0xff]  }
0x1162   :  { %2890 = vmatpush3.bf16.msra.mxu1 %v1773_v45  ;;  %2908 = vmatpush3.bf16.msra.mxu0 %v3441_v34  ;;  %v3022_v45 = vld [vmem:[#allocation8 + $0x14] ss:$24 sps:$4 sm:$0xff]  }
0x1163   :  { %v1867_v3 = vpop.permute.xlu0 %1866  ;;  %2901 = vmatprep.subr.bf16.mxu1 %v3276_v0  ;;  %2909 = vmatprep.subr.bf16.mxu0 %v3276_v0 }
0x1164   :  { %v1869_v46 = vsel %vm288_vm2, %v1867_v3, 0  ;;  %2911 = vmatprep.mubr.msk.bf16.mxu0 %vm3278_vm0, %v3276_v0  ;;  %v3024_v3 = vld [vmem:[#allocation8 + $0x10] ss:$24 sps:$4 sm:$0xff]  }
0x1165   :  { %2892 = vmatmul.mubr.msk.bf16.vlgmr.msra.gmra.mxu1 %vm284_vm3, %v3435_v31 }
0x1166   :  { %2902 = vmatpush3.bf16.msra.mxu1 %v1869_v46  ;;  %2910 = vmatpush3.bf16.msra.mxu0 %v3452_v37 }
0x1167   :  { %2903 = vmatprep.mubr.msk.bf16.mxu1 %vm3278_vm0, %v3276_v0  ;;  %2915 = vmatprep.subr.bf16.mxu1 %v3276_v0 }
0x1168   :  { %2921 = vmatprep.subr.bf16.mxu0 %v3276_v0 }
0x1169   :  { %2912 = vmatmul.mubr.msk.bf16.vlgmr.msra.gmra.mxu0 %vm195_vm1, %v1633_v23 }
0x116a   :  { %2925 = vmatprep.mubr.msk.bf16.mxu0 %vm3278_vm0, %v3276_v0 }
0x116d   :  { %2904 = vmatmul.mubr.msk.bf16.vlgmr.msra.gmra.mxu1 %vm284_vm3, %v3458_v38 }
0x116e   :  { %2917 = vmatprep.mubr.msk.bf16.mxu1 %vm3278_vm0, %v3276_v0 }
0x11ab   :  { %v1758_v31 = vpop.f32.mrf.mxu0 }
0x11ac   :  { %v1764_v1 = vadd.f32 %v1758_v31, %v3477_v43 }
0x11ad   :  { %v2887_v33 = vpop.f32.mrf.mxu0 }
0x11af   :  { %v1761_v7 = vpop.f32.mrf.mxu0 }
0x11b1   :  { %v2888_v47 = vpop.f32.mrf.mxu0 }
0x1221   :  { %v1859_v5 = vpop.f32.mrf.mxu0 }
0x1223   :  { %v2899_v48 = vpop.f32.mrf.mxu0 }
0x1225   :  { %v1809_v50 = vpop.f32.mrf.mxu1  ;;  %v1862_v51 = vpop.f32.mrf.mxu0 }
0x1226   :  { %v1815_v6 = vadd.f32 %v1809_v50, %v1764_v1 }
0x1227   :  { %v2893_v27 = vpop.f32.mrf.mxu1  ;;  %v2900_v52 = vpop.f32.mrf.mxu0 }
0x1228   :  { %v1865_v53 = vadd.f32 %v1859_v5, %v1815_v6 }
0x1229   :  { %v1812_v55 = vpop.f32.mrf.mxu1  ;;  %v1946_v56 = vpop.f32.mrf.mxu0 }
0x122a   :  { %v1959_v38 = vadd.f32 %v1946_v56, %v3480_v54 }
0x122b   :  { %v2894_v57 = vpop.f32.mrf.mxu1  ;;  %v2913_v58 = vpop.f32.mrf.mxu0 }
0x122c   :  { %1961 = vrot.lane.b32.xlu1 %v1959_v38, %s3265_s24  ;;  %v2153_v38 = vlaneseq  ;;  %v2251_v58 = vld [vmem:[#allocation11 + $0x1] sm:$0x3] }
0x122d   :  { %v1905_v59 = vpop.f32.mrf.mxu1  ;;  %v1949_v60 = vpop.f32.mrf.mxu0 }
0x122e   :  { %v1911_v61 = vadd.f32 %v1905_v59, %v1865_v53  ;;  %v3763_v57 = vshrl.u32 %v2153_v38, 7 }
0x122f   :  { %v2914_v62 = vpop.f32.mrf.mxu0  ;;  %v2905_v63 = vpop.f32.mrf.mxu1 }
0x1230   :  { %v1952_v10 = vadd.f32 %v1946_v56, %v1911_v61  ;;  %v2159_v59 = vsub.s32 1, %v3763_v57  ;;  %v2155_v60 = vsub.s32 0, %v3763_v57  ;;  %v3025_v63 = vld [vmem:[#allocation10 + $0x18] sm:$0xff]  }
0x1231   :  { %v1908_v43 = vpop.f32.mrf.mxu1 }
0x1232   :  { %v2598_v12 = vmul.f32 -1.442695, %v1952_v10  ;;  %v2317_v62 = vrot.slane %v2251_v58, %v2155_v60  ;;  %v3026_v43 = vld [vmem:[#allocation10 + $0x10] sm:$0xff]   ;;  %v3028_v10 = vld [vmem:[#allocation10] sm:$0xff]  }
0x1233   :  { %v2906_v9 = vpop.f32.mrf.mxu1 }
0x1234   :  { %3053 = vpow2.f32 %v2598_v12  ;;  %v3027_v9 = vld [vmem:[#allocation10 + $0x8] sm:$0xff]  }
0x1241   :  { %v3054_v13 = vpop.eup %3053 }
0x1242   :  { %v1956_v49 = vadd.f32 1.0, %v3054_v13 }
0x1244   :  { %3055 = vrcp.f32 %v1956_v49 }
0x1251   :  { %v3056_v14 = vpop.eup %3055 }
0x1252   :  { %v1971_v23 = vsub.f32 1.0, %v3056_v14  ;;  %v1977_v24 = vmul.f32 %v3056_v14, %v3674_v21 }
0x129e   :  { %v1962_v15 = vpop.permute.xlu1 %1961 }
0x129f   :  { %v1964_v16 = vmul.f32 %v3056_v14, %v1962_v15 }
0x12a1   :  { %1966 = vrot.lane.b32.xlu0 %v1964_v16, %s3265_s24 }
0x1313   :  { %v1967_v17 = vpop.permute.xlu0 %1966 }
0x1314   :  { %v1969_v19 = vadd.f32 %v1967_v17, %v1911_v61  ;;  %v2321_v61 = vrot.slane %v2251_v58, %v2159_v59  ;;  %v2252_v17 = vld [vmem:[%s3825_s8] sm:$0xff] }
0x1316   :  { %3057 = vtanh.f32 %v1969_v19 }
0x1323   :  { %v3058_v20 = vpop.eup %3057 }
0x1324   :  { %1973 = vrot.lane.b32.xlu1 %v3058_v20, %s3280_s7 }
0x1328   :  { %2043 = vrot.lane.b32.xlu1 %v3441_v34, %s3279_s6 }
0x132c   :  { %2047 = vrot.lane.b32.xlu1 %v3071_v22, %s3280_s7 }
0x1330   :  { %2263 = vrot.lane.b32.xlu1 %v3016_v36, %s3280_s7 }
0x1334   :  { %2183 = vrot.lane.b32.xlu1 %v3019_v44, %s3280_s7 }
0x1338   :  { %2179 = vrot.lane.b32.xlu1 %v3022_v45, %s3280_s7 }
0x133c   :  { %2348 = vrot.lane.b32.xlu1 %v2321_v61, %s3279_s6 }
0x1340   :  { %2402 = vrot.lane.b32.xlu1 %v3026_v43, %s3265_s24 }
0x1344   :  { %2398 = vrot.lane.b32.xlu1 %v3028_v10, %s3265_s24 }
0x1396   :  { %v1974_v11 = vpop.permute.xlu1 %1973 }
0x1397   :  { %v1976_v25 = vmul.f32 %v1974_v11, %v1971_v23 }
0x1399   :  { %v1978_v26 = vadd.f32 %v1977_v24, %v1976_v25 }
0x139a   :  { %v2044_v28 = vpop.permute.xlu1 %2043 }
0x139b   :  { %v1979_v29 = vmax.f32 %v1978_v26, 0.0  ;;  %2922 = vmatpush3.bf16.msra.mxu0 %v2044_v28 }
0x139c   :  { %2923 = vmatprep.subr.bf16.mxu0 %v3276_v0 }
0x139d   :  { %v1980_v8 = vpack.c.bf16 %v1979_v29, %v1979_v29 }
0x139e   :  { %v2048_v46 = vpop.permute.xlu1 %2047 }
0x139f   :  { %1983 = vrot.lane.b32.xlu0 %v1980_v8, %s3280_s7 }
0x13a2   :  { %v2264_v51 = vpop.permute.xlu1 %2263 }
0x13a3   :  { %2041 = vrot.lane.b32.xlu0 %v3452_v37, %s3279_s6 }
0x13a6   :  { %v2184_v27 = vpop.permute.xlu1 %2183 }
0x13a7   :  { %2265 = vrot.lane.b32.xlu0 %v3015_v35, %s3280_s7 }
0x13aa   :  { %v2180_v55 = vpop.permute.xlu1 %2179 }
0x13ab   :  { %2181 = vrot.lane.b32.xlu0 %v3021_v18, %s3280_s7  ;;  %v3281_v18 = vmov 1  }
0x13ac   :  { %3003 = vset.pattern.permute.xlu1 %v3281_v18 }
0x13ae   :  { %v2349_v28 = vpop.permute.xlu1 %2348 }
0x13af   :  { %2177 = vrot.lane.b32.xlu0 %v3024_v3, %s3280_s7 }
0x13b3   :  { %2346 = vrot.lane.b32.xlu0 %v2317_v62, %s3279_s6 }
0x13b7   :  { %2404 = vrot.lane.b32.xlu0 %v3025_v63, %s3265_s24 }
0x13bb   :  { %2400 = vrot.lane.b32.xlu0 %v3027_v9, %s3265_s24 }
0x1411   :  { %v1984_v34 = vpop.permute.xlu0 %1983 }
0x1412   :  { %v1989_v30 = vsel %vm288_vm2, %v1984_v34, 0 }
0x1413   :  { %2916 = vmatpush3.bf16.msra.mxu1 %v1989_v30 }
0x1414   :  { %2929 = vmatprep.subr.bf16.mxu1 %v3276_v0 }
0x1415   :  { %v2042_v21 = vpop.permute.xlu0 %2041 }
0x1416   :  { %2918 = vmatmul.mubr.msk.bf16.vlgmr.msra.gmra.mxu1 %vm284_vm3, %v1981_v32  ;;  %2924 = vmatpush3.bf16.msra.mxu0 %v2042_v21 }
0x1417   :  { %2933 = vmatprep.mubr.msk.bf16.mxu1 %vm3278_vm0, %v3276_v0  ;;  %2937 = vmatprep.subr.bf16.mxu0 %v3276_v0 }
0x1418   :  { %2930 = vmatpush3.bf16.msra.mxu1 %v3017_v41 }
0x1419   :  { %2931 = vmatprep.subr.bf16.mxu1 %v3276_v0  ;;  %v2266_v50 = vpop.permute.xlu0 %2265 }
0x141c   :  { %2932 = vmatpush3.bf16.msra.mxu1 %v3018_v42 }
0x141d   :  { %2945 = vmatprep.subr.bf16.mxu1 %v3276_v0  ;;  %v2182_v6 = vpop.permute.xlu0 %2181 }
0x141e   :  { %v2187_v52 = vsel %vm2185_vm5, %v2182_v6, %v2184_v27 }
0x1421   :  { %v2178_v53 = vpop.permute.xlu0 %2177 }
0x1422   :  { %v2186_v56 = vsel %vm2185_vm5, %v2178_v53, %v2180_v55  ;;  %v2468_v53 = vld [vmem:[#allocation14] sm:$0x1] }
0x1425   :  { %v2347_v26 = vpop.permute.xlu0 %2346 }
0x1426   :  { %v2350_v29 = vsel %vm195_vm1, %v2347_v26, %v2349_v28 }
0x1429   :  { %v2405_v8 = vpop.permute.xlu0 %2404 }
0x142d   :  { %v2401_v30 = vpop.permute.xlu0 %2400 }
0x14d6   :  { %v2025_v37 = vpop.f32.mrf.mxu1 }
0x14d7   :  { %v2040_v39 = vpack.c.bf16 %v2025_v37, %v2025_v37 }
0x14d8   :  { %v2919_v40 = vpop.f32.mrf.mxu1 }
0x14d9   :  { %2926 = vmatmul.mubr.msk.bf16.vlgmr.msra.gmra.mxu0 %vm195_vm1, %v2040_v39 }
0x14da   :  { %v2028_v2 = vpop.f32.mrf.mxu1  ;;  %2941 = vmatprep.mubr.msk.bf16.mxu0 %vm3278_vm0, %v3276_v0  ;;  %2938 = vmatpush3.bf16.msra.mxu0 %v2187_v52 }
0x14db   :  { %2939 = vmatprep.subr.bf16.mxu0 %v3276_v0 }
0x14dc   :  { %v2920_v4 = vpop.f32.mrf.mxu1 }
0x14de   :  { %2940 = vmatpush3.bf16.msra.mxu0 %v2186_v56 }
0x14df   :  { %2953 = vmatprep.subr.bf16.mxu0 %v3276_v0 }
0x1599   :  { %v2087_v31 = vpop.f32.mrf.mxu0 }
0x159a   :  { %v2088_v33 = vadd.f32 %v2087_v31, %v2048_v46 }
0x159b   :  { %v2927_v7 = vpop.f32.mrf.mxu0 }
0x159c   :  { %3059 = vtanh.f32 %v2088_v33 }
0x159d   :  { %v2090_v47 = vpop.f32.mrf.mxu0 }
0x159f   :  { %v2928_v5 = vpop.f32.mrf.mxu0 }
0x15a0   :  { %v2461_v5 = vld [vmem:[%s3827_s10] sm:$0xf] }
0x15a9   :  { %v3060_v48 = vpop.eup %3059 }
0x15aa   :  { %v2094_v1 = vpack.c.bf16 %v3060_v48, %v3060_v48  ;;  %v2454_v48 = vld [vmem:[%s3826_s9] sm:$0xf]  ;;  %s3282_s9 = smov [#allocation16]  }
0x15ab   :  { %s2537_s14 = sshll.u32 %s3282_s9, 4  ;;  %s2538_s14 = int_to_ptr.vmem [resolvable:$true] %s2537_s14 }
0x15ac   :  { %2934 = vmatmul.mubr.msk.bf16.vlgmr.msra.gmra.mxu1 %vm195_vm1, %v2094_v1  ;;  %p3237_p13 = scmp.lt.s32.totalorder %s2538_s14, %s2538_s14 }
0x15ad   :  { %2946 = vmatpush3.bf16.msra.mxu1 %v2266_v50  ;;  %2949 = vmatprep.mubr.msk.bf16.mxu1 %vm3278_vm0, %v3276_v0 }
0x15ae   :  { %2947 = vmatprep.subr.bf16.mxu1 %v3276_v0 }
0x15b1   :  { %2948 = vmatpush3.bf16.msra.mxu1 %v2264_v51 }
0x15b2   :  { %2965 = vmatprep.subr.bf16.mxu1 %v3276_v0 }
0x15b4   :  { %2950 = vmatmul.mubr.msk.bf16.vlgmr.msra.gmra.mxu1 %vm195_vm1, %v1984_v34  ;;  %v2403_v34 = vpop.permute.xlu1 %2402 }
0x15b5   :  { %2973 = vmatprep.mubr.msk.bf16.mxu1 %vm3278_vm0, %v3276_v0  ;;  %2966 = vmatpush3.bf16.msra.mxu1 %v2405_v8 }
0x15b6   :  { %2967 = vmatprep.subr.bf16.mxu1 %v3276_v0 }
0x15b8   :  { %v2399_v32 = vpop.permute.xlu1 %2398 }
0x15b9   :  { %2968 = vmatpush3.bf16.msra.mxu1 %v2403_v34 }
0x15ba   :  { %2969 = vmatprep.subr.bf16.mxu1 %v3276_v0 }
0x15bd   :  { %2970 = vmatpush3.bf16.msra.mxu1 %v2401_v30 }
0x15be   :  { %2971 = vmatprep.subr.bf16.mxu1 %v3276_v0 }
0x15c1   :  { %2972 = vmatpush3.bf16.msra.mxu1 %v2399_v32 }
0x166c   :  { %v2144_v12 = vpop.f32.mrf.mxu1 }
0x166d   :  { %v2145_v13 = vadd.f32 %v2144_v12, %v3480_v54 }
0x166e   :  { %v2935_v49 = vpop.f32.mrf.mxu1 }
0x166f   :  { %3061 = vtanh.f32 %v2145_v13 }
0x1670   :  { %v2147_v14 = vpop.f32.mrf.mxu1 }
0x1672   :  { %v2936_v15 = vpop.f32.mrf.mxu1 }
0x1674   :  { %v2305_v16 = vpop.f32.mrf.mxu1 }
0x1675   :  { %v2306_v22 = vadd.f32 %v2305_v16, %v2252_v17 }
0x1676   :  { %v2951_v19 = vpop.f32.mrf.mxu1 }
0x1677   :  { %3063 = vtanh.f32 %v2306_v22 }
0x1678   :  { %v2308_v20 = vpop.f32.mrf.mxu1 }
0x167a   :  { %v2952_v23 = vpop.f32.mrf.mxu1 }
0x167c   :  { %v3062_v11 = vpop.eup %3061 }
0x167d   :  { %v2151_v24 = vpack.c.bf16 %v3062_v11, %v3062_v11 }
0x167f   :  { %2942 = vmatmul.mubr.msk.bf16.vlgmr.msra.gmra.mxu0 %vm195_vm1, %v2151_v24 }
0x1680   :  { %2954 = vmatpush3.bf16.msra.mxu0 %v3025_v63  ;;  %2961 = vmatprep.mubr.msk.bf16.mxu0 %vm3278_vm0, %v3276_v0 }
0x1681   :  { %2955 = vmatprep.subr.bf16.mxu0 %v3276_v0 }
0x1684   :  { %2956 = vmatpush3.bf16.msra.mxu0 %v3026_v43  ;;  %v3064_v54 = vpop.eup %3063 }
0x1685   :  { %2957 = vmatprep.subr.bf16.mxu0 %v3276_v0  ;;  %v2312_v25 = vpack.c.bf16 %v3064_v54, %v3064_v54 }
0x1688   :  { %2958 = vmatpush3.bf16.msra.mxu0 %v3027_v9 }
0x1689   :  { %2959 = vmatprep.subr.bf16.mxu0 %v3276_v0 }
0x168c   :  { %2960 = vmatpush3.bf16.msra.mxu0 %v3028_v10 }
0x168d   :  { %2977 = vmatprep.subr.bf16.mxu0 %v3276_v0 }
0x168f   :  { %2962 = vmatmul.mubr.msk.bf16.vlgmr.msra.gmra.mxu0 %vm397_vm4, %v2312_v25 }
0x1690   :  { %2979 = vmatprep.mubr.msk.bf16.mxu0 %vm3278_vm0, %v3276_v0  ;;  %v2039_v0 = vld [vmem:[#allocation11] sm:$0x3] }
0x1691   :  { %v2156_v31 = vrot.slane %v2039_v0, %v2155_v60  ;;  %v2160_v33 = vrot.slane %v2039_v0, %v2159_v59  ;;  %v2516_v59 = vld [vmem:[%s3828_s11] sm:$0x3]  ;;  %s3232_s11 = scalar_lea.vmem %s2538_s14, 32 }
0x1692   :  { %p3233_p12 = scmp.ne.s32.totalorder %s2538_s14, %s3232_s11  ;;  %p3238_p0 = scmp.lt.s32.totalorder %s3232_s11, %s3232_s11 }
0x1694   :  { %p3239_p1 = por %p3238_p0, %p3237_p13 }
0x1696   :  { %p3240_p2 = pnand %p3239_p1, %p3233_p12 }
0x173f   :  { %v2233_v21 = vpop.f32.mrf.mxu0 }
0x1741   :  { %v2943_v35 = vpop.f32.mrf.mxu0 }
0x1743   :  { %v2236_v36 = vpop.f32.mrf.mxu0 }
0x1745   :  { %v2944_v37 = vpop.f32.mrf.mxu0 }
0x174f   :  { %v2390_v39 = vpop.f32.mrf.mxu0 }
0x1750   :  { %v2391_v40 = vadd.f32 %v2390_v39, %v2350_v29 }
0x1751   :  { %v2963_v2 = vpop.f32.mrf.mxu0 }
0x1752   :  { %3065 = vtanh.f32 %v2391_v40 }
0x1753   :  { %v2393_v4 = vpop.f32.mrf.mxu0 }
0x1755   :  { %v2964_v41 = vpop.f32.mrf.mxu0 }
0x175f   :  { %v3066_v42 = vpop.eup %3065 }
0x1760   :  { %v2397_v44 = vpack.c.bf16 %v3066_v42, %v3066_v42 }
0x1762   :  { %2974 = vmatmul.mubr.msk.bf16.vlgmr.msra.gmra.mxu1 %vm397_vm4, %v2397_v44 }
0x1822   :  { %v2447_v45 = vpop.f32.mrf.mxu1 }
0x1823   :  { %v2453_v3 = vpack.c.bf16 %v2447_v45, %v2447_v45 }
0x1824   :  { %v2975_v46 = vpop.f32.mrf.mxu1 }
0x1825   :  { %2463 = vperm.xlu1 %3003, %v2453_v3   ;;  %2457 = vperm.xlu0 %3002, %v2453_v3  }
0x1826   :  { %v2450_v7 = vpop.f32.mrf.mxu1 }
0x1828   :  { %v2976_v47 = vpop.f32.mrf.mxu1 }
0x1829   :  { %2190 = vrot.lane.b32.xlu1 %v2156_v31, %s3279_s6  ;;  %2192 = vrot.lane.b32.xlu0 %v2160_v33, %s3279_s6 }
0x182a   :  { %3004 = vset.pattern.permute.xlu0 %v3281_v18 }
0x18a0   :  { %v2464_v1 = vpop.permute.xlu1 %2463  ;;  %v2458_v50 = vpop.permute.xlu0 %2457 }
0x18a1   :  { %v2466_v51 = vmul.bf16 %v2464_v1, %v2461_v5  ;;  %v2460_v6 = vmul.bf16 %v2458_v50, %v2454_v48 }
0x18a3   :  { %v2467_v27 = vadd.bf16 %v2466_v51, %v2460_v6 }
0x18a4   :  { %v2191_v55 = vpop.permute.xlu1 %2190  ;;  %v2193_v56 = vpop.permute.xlu0 %2192 }
0x18a5   :  { %v2473_v52 = vsel %vm288_vm2, %v2467_v27, 0  ;;  %v2194_v38 = vsel %vm195_vm1, %v2191_v55, %v2193_v56 }
0x18a6   :  { %2978 = vmatpush3.bf16.msra.mxu0 %v2473_v52  ;;  %v2234_v57 = vadd.f32 %v2233_v21, %v2194_v38 }
0x18a9   :  { %2980 = vmatmul.mubr.msk.bf16.vlgmr.msra.gmra.mxu0 %vm284_vm3, %v2468_v53 }
0x1969   :  { %v2509_v58 = vpop.f32.mrf.mxu0 }
0x196a   :  { %v2515_v60 = vadd.f32 %v2509_v58, %v2234_v57 }
0x196b   :  { %v2981_v61 = vpop.f32.mrf.mxu0 }
0x196c   :  { %v2517_v62 = vadd.f32 %v2516_v59, %v2515_v60 }
0x196d   :  { %v2512_v63 = vpop.f32.mrf.mxu0 }
0x196e   :  { %v2519_v43 = vsel %vm2518_vm6, %v2517_v62, -inf }
0x196f   :  { %2520 = vmax.xlane.f32.xlu1 %v2519_v43  ;;  %v2982_v9 = vpop.f32.mrf.mxu0 }
0x19f8   :  { %v2521_v10 = vpop.xlane.xlu1 %2520 }
0x19f9   :  { %v2522_v12 = vsub.f32 %v2517_v62, %v2521_v10 }
0x19fb   :  { %v2523_v13 = vmul.f32 1.442695, %v2522_v12 }
0x19fd   :  { %3067 = vpow2.f32 %v2523_v13 }
0x1a0a   :  { %v3068_v49 = vpop.eup %3067 }
0x1a0b   :  { %v2525_v14 = vsel %vm2518_vm6, %v3068_v49, 0.0 }
0x1a0c   :  { %2526 = vadd.xlane.f32.xlu0 %v2525_v14 }
0x1a95   :  { %v2527_v15 = vpop.xlane.xlu0 %2526 }
0x1a96   :  { %3069 = vrcp.f32 %v2527_v15 }
0x1aa3   :  { %v3070_v16 = vpop.eup %3069 }
0x1aa4   :  { %v2529_v17 = vmul.f32 %v3070_v16, %v3068_v49 }
0x1aa6   :  { %2530 = vst [vmem:[#allocation16] sm:$0x3] %v2529_v17 }
0x1aa7   :  { %3243 = shalt.err (!%p3240_p2)
}
0x1aa8   :  { %2540 = dma.vmem_to_hbm [thread:$0]  %s2538_s14, 32, %s3829_s12, [#allocation4]  }
0x1aa9   :  { %3262 = dma.done.wait [#allocation4], 32  }
0x1aaa   :  { %3263 = vsyncadd [#allocation4], 4294967264 }
0x1aab   :  { %2544 = vsyncpa [#allocation3], 1 }
0x1aac   :  { %2545 = vsyncpa [#allocation6], 1 }
0x1aad   :  { %2546 = vsyncpa [#allocation9], 1 }
0x1aae   :  { %2547 = vsyncpa [#allocation12], 1 }
0x1aaf   :  { %2548 = vsyncpa [#allocation15], 1 }
0x1ab0   :  { %2549 = vsyncpa [#allocation4], 1 }

</bundles_post_ra>
